<compile_context>
chip_gen: v7x
topology: tpu7x:2x2x1
jax: 0.10.0
libtpu: 0.0.40
codegen_flags: <defaults>
</compile_context>

<pallas_src>
import functools

import jax
import jax.numpy as jnp
from jax.experimental import pallas as pl
from jax.experimental.pallas import tpu as pltpu

LANE = 128
TILE_B = 128     # batch tile per grid step (multiple of 16 for bf16 sublane packing)
MU_SZ = 20       # enc_layer_mu is nn.Linear(64, 20) in the torch module (hardwired)


def _round_up(n, m):
    return (n + m - 1) // m * m


# ----------------------------- Pallas kernel --------------------------------
def vae_kernel(lat_pad,
               # per-batch-tile inputs
               x_ref, eps_ref,
               # encoder params (bf16 weights, f32 biases)
               ew1_ref, eb1_ref, ew2_ref, eb2_ref, ew3_ref, eb3_ref,
               ehw_ref, ehb_ref,                       # fused mu|logvar head
               # decoder params
               dw1_ref, db1_ref, dw2_ref, db2_ref, dw3_ref, db3_ref,
               dw4_ref, db4_ref, dwo_ref, dbo_ref,
               # outputs
               mlz_ref, xp_ref):
    def linear(h, w_ref, b_ref):
        # bf16 x bf16 on the MXU with f32 accumulation, f32 bias add.
        return jnp.dot(h.astype(jnp.bfloat16), w_ref[...],
                       preferred_element_type=jnp.float32) + b_ref[...]

    relu = lambda y: jnp.maximum(y, 0.0)

    # ----- encoder -----
    h = relu(linear(x_ref[...], ew1_ref, eb1_ref))     # (TB, 256)
    h = relu(linear(h, ew2_ref, eb2_ref))              # (TB, 128)
    h = relu(linear(h, ew3_ref, eb3_ref))              # (TB, 64)

    # fused mu / logvar head: one lane-dense matmul, split with static slices
    head = linear(h, ehw_ref, ehb_ref)                 # (TB, 2*lat_pad) f32
    mu = head[:, :lat_pad]
    logvar = head[:, lat_pad:]

    # reparameterization exactly as in the torch module: z = mu + eps * logvar
    z = mu + eps_ref[...] * logvar                     # (TB, lat_pad) f32

    # ----- decoder -----
    d = relu(linear(z, dw1_ref, db1_ref))              # (TB, 128)  (28 zero-padded)
    d = relu(linear(d, dw2_ref, db2_ref))              # (TB, 64)
    d = relu(linear(d, dw3_ref, db3_ref))              # (TB, 128)
    d = relu(linear(d, dw4_ref, db4_ref))              # (TB, 256)
    logits = linear(d, dwo_ref, dbo_ref)               # (TB, in_pad)
    # numerically stable sigmoid; tanh runs on the EUP slot.
    xp_ref[...] = 0.5 * (jnp.tanh(0.5 * logits) + 1.0)

    # lane-dense packed store of mu / logvar / z (all offsets multiples of 128)
    mlz_ref[:, :lat_pad] = mu
    mlz_ref[:, lat_pad:2 * lat_pad] = logvar
    mlz_ref[:, 2 * lat_pad:] = z


# --------------------------- parameter handling ------------------------------
_LAYER_DIMS = (
    ("enc1", "input", 256),
    ("enc2", 256, 128),
    ("enc3", 128, 64),
    ("enc_mu", 64, MU_SZ),
    ("enc_var", 64, "latent"),
    ("dec1", "latent", 28),
    ("dec2", 28, 64),
    ("dec3", 64, 128),
    ("dec4", 128, 256),
    ("dec_out", 256, "input"),
)


def make_params(key, input_sz, latent_sz):
    """PyTorch-Linear-like init; weights stored transposed as (in, out), f32."""
    sizes = {"input": input_sz, "latent": latent_sz}
    params = {}
    keys = jax.random.split(key, len(_LAYER_DIMS))
    for k, (name, fi, fo) in zip(keys, _LAYER_DIMS):
        fi = sizes.get(fi, fi)
        fo = sizes.get(fo, fo)
        kw, kb = jax.random.split(k)
        bound = 1.0 / (fi ** 0.5)
        params[name + "_w"] = jax.random.uniform(kw, (fi, fo), jnp.float32, -bound, bound)
        params[name + "_b"] = jax.random.uniform(kb, (1, fo), jnp.float32, -bound, bound)
    return params


def _pad_w(w, rows, cols):
    w = w.astype(jnp.bfloat16)
    return jnp.zeros((rows, cols), jnp.bfloat16).at[: w.shape[0], : w.shape[1]].set(w)


def _pad_b(b, cols):
    return jnp.zeros((1, cols), jnp.float32).at[:, : b.shape[1]].set(b.astype(jnp.float32))


def pack_params(p, input_sz, latent_sz):
    """One-time packing: cast weights to bf16, zero-pad odd widths, fuse mu/logvar head."""
    if latent_sz != MU_SZ:
        # The torch module's sample() broadcast (mu + eps*logvar) only works when
        # latent_sz == 20 because enc_layer_mu is hardwired to 20 outputs.
        raise ValueError("latent_sz must equal 20 to match the original module")

    in_pad = _round_up(input_sz, LANE)
    lat_pad = _round_up(max(latent_sz, MU_SZ), LANE)
    hid_pad = _round_up(28, LANE)

    # fused head: mu in cols [:lat_pad], logvar in cols [lat_pad:2*lat_pad]
    ehw = jnp.zeros((64, 2 * lat_pad), jnp.bfloat16)
    ehw = ehw.at[:, :MU_SZ].set(p["enc_mu_w"].astype(jnp.bfloat16))
    ehw = ehw.at[:, lat_pad:lat_pad + latent_sz].set(p["enc_var_w"].astype(jnp.bfloat16))
    ehb = jnp.zeros((1, 2 * lat_pad), jnp.float32)
    ehb = ehb.at[:, :MU_SZ].set(p["enc_mu_b"])
    ehb = ehb.at[:, lat_pad:lat_pad + latent_sz].set(p["enc_var_b"])

    packed = (
        _pad_w(p["enc1_w"], in_pad, 256), _pad_b(p["enc1_b"], 256),
        _pad_w(p["enc2_w"], 256, 128),    _pad_b(p["enc2_b"], 128),
        _pad_w(p["enc3_w"], 128, 64),     _pad_b(p["enc3_b"], 64),
        ehw, ehb,
        _pad_w(p["dec1_w"], lat_pad, hid_pad), _pad_b(p["dec1_b"], hid_pad),
        _pad_w(p["dec2_w"], hid_pad, 64),      _pad_b(p["dec2_b"], 64),
        _pad_w(p["dec3_w"], 64, 128),          _pad_b(p["dec3_b"], 128),
        _pad_w(p["dec4_w"], 128, 256),         _pad_b(p["dec4_b"], 256),
        _pad_w(p["dec_out_w"], 256, in_pad),   _pad_b(p["dec_out_b"], in_pad),
    )
    return packed


# ------------------------------ JAX wrapper ----------------------------------
@jax.jit
def vae_forward(x, eps, packed):
    B, input_sz = x.shape
    latent_sz = eps.shape[1]
    in_pad = packed[0].shape[0]            # padded input width (enc1 weight rows)
    lat_pad = packed[6].shape[1] // 2      # padded latent width (fused head cols / 2)

    n_b = pl.cdiv(B, TILE_B)
    b_pad = n_b * TILE_B

    # Pad batch + feature dims; activations stream in bf16, eps stays f32.
    x_p = jnp.zeros((b_pad, in_pad), jnp.bfloat16).at[:B, :input_sz].set(
        x.astype(jnp.bfloat16))
    eps_p = jnp.zeros((b_pad, lat_pad), jnp.float32).at[:B, :latent_sz].set(eps)

    def batch_spec(cols):
        return pl.BlockSpec((TILE_B, cols), lambda b: (b, 0))

    def resident_spec(arr):
        # constant block index -> weight stays resident in VMEM across the grid
        return pl.BlockSpec(arr.shape, lambda b: (0, 0))

    in_specs = ([batch_spec(in_pad), batch_spec(lat_pad)]
                + [resident_spec(a) for a in packed])
    out_specs = (batch_spec(3 * lat_pad), batch_spec(in_pad))
    out_shape = (
        jax.ShapeDtypeStruct((b_pad, 3 * lat_pad), jnp.float32),  # packed mu|logvar|z
        jax.ShapeDtypeStruct((b_pad, in_pad), jnp.float32),       # x_prime
    )

    mlz, xp = pl.pallas_call(
        functools.partial(vae_kernel, lat_pad),
        grid=(n_b,),
        in_specs=in_specs,
        out_specs=out_specs,
        out_shape=out_shape,
        compiler_params=pltpu.CompilerParams(
            dimension_semantics=("parallel",)),   # batch tiles split across TCs on v7x
    )(x_p, eps_p, *packed)

    mu = mlz[:B, :MU_SZ]
    logvar = mlz[:B, lat_pad:lat_pad + latent_sz]
    z = mlz[:B, 2 * lat_pad:2 * lat_pad + latent_sz]
    x_prime = xp[:B, :input_sz]
    return mu, logvar, z, x_prime


# --------------------------- reference (pure JAX) -----------------------------
def vae_forward_ref(x, eps, p):
    """Same math as the kernel (bf16 weights/activations, f32 accumulation), unpadded."""
    def lin(h, w, b):
        return jnp.dot(h.astype(jnp.bfloat16), w.astype(jnp.bfloat16),
                       preferred_element_type=jnp.float32) + b

    h = jax.nn.relu(lin(x, p["enc1_w"], p["enc1_b"]))
    h = jax.nn.relu(lin(h, p["enc2_w"], p["enc2_b"]))
    h = jax.nn.relu(lin(h, p["enc3_w"], p["enc3_b"]))
    mu = lin(h, p["enc_mu_w"], p["enc_mu_b"])
    logvar = lin(h, p["enc_var_w"], p["enc_var_b"])
    z = mu + eps * logvar
    d = jax.nn.relu(lin(z, p["dec1_w"], p["dec1_b"]))
    d = jax.nn.relu(lin(d, p["dec2_w"], p["dec2_b"]))
    d = jax.nn.relu(lin(d, p["dec3_w"], p["dec3_b"]))
    d = jax.nn.relu(lin(d, p["dec4_w"], p["dec4_b"]))
    x_prime = jax.nn.sigmoid(lin(d, p["dec_out_w"], p["dec_out_b"]))
    return mu, logvar, z, x_prime


if __name__ == "__main__":
    # args.input_sz = 256, args.latent_sz = 20 (must be 20: enc_layer_mu is Linear(64, 20)
    # and sample() broadcasts mu + eps * logvar).  B=200 exercises batch padding + a
    # 2-step "parallel" grid.
    B = 200
    INPUT_SZ = 256
    LATENT_SZ = 20

    key = jax.random.PRNGKey(0)
    k_x, k_eps, k_params = jax.random.split(key, 3)

    x = jax.random.uniform(k_x, (B, INPUT_SZ), jnp.float32)
    eps = jax.random.normal(k_eps, (B, LATENT_SZ), jnp.float32)   # torch.randn equivalent
    params = make_params(k_params, INPUT_SZ, LATENT_SZ)
    packed = pack_params(params, INPUT_SZ, LATENT_SZ)

    mu, logvar, z, x_prime = vae_forward(x, eps, packed)
    jax.block_until_ready((mu, logvar, z, x_prime))

    # Correctness check against a pure-JAX reference doing the same bf16/f32 math.
    mu_r, logvar_r, z_r, xp_r = vae_forward_ref(x, eps, params)
    assert mu.shape == (B, MU_SZ) and logvar.shape == (B, LATENT_SZ)
    assert z.shape == (B, LATENT_SZ) and x_prime.shape == (B, INPUT_SZ)
    assert jnp.allclose(mu, mu_r, atol=2e-3, rtol=2e-3), "mu mismatch"
    assert jnp.allclose(logvar, logvar_r, atol=2e-3, rtol=2e-3), "logvar mismatch"
    assert jnp.allclose(z, z_r, atol=2e-3, rtol=2e-3), "z mismatch"
    assert jnp.allclose(x_prime, xp_r, atol=2e-3, rtol=2e-3), "x_prime mismatch"

    print("KERNEL_OK")
</pallas_src>

<mosaic_0001>
module attributes {stable_mosaic.version = 11 : i64} {
  func.func @vae_kernel(%arg0: i32, %arg1: memref<128x256xbf16, #tpu.memory_space<vmem>>, %arg2: memref<128x128xf32, #tpu.memory_space<vmem>>, %arg3: memref<256x256xbf16, #tpu.memory_space<vmem>>, %arg4: memref<1x256xf32, #tpu.memory_space<vmem>>, %arg5: memref<256x128xbf16, #tpu.memory_space<vmem>>, %arg6: memref<1x128xf32, #tpu.memory_space<vmem>>, %arg7: memref<128x64xbf16, #tpu.memory_space<vmem>>, %arg8: memref<1x64xf32, #tpu.memory_space<vmem>>, %arg9: memref<64x256xbf16, #tpu.memory_space<vmem>>, %arg10: memref<1x256xf32, #tpu.memory_space<vmem>>, %arg11: memref<128x128xbf16, #tpu.memory_space<vmem>>, %arg12: memref<1x128xf32, #tpu.memory_space<vmem>>, %arg13: memref<128x64xbf16, #tpu.memory_space<vmem>>, %arg14: memref<1x64xf32, #tpu.memory_space<vmem>>, %arg15: memref<64x128xbf16, #tpu.memory_space<vmem>>, %arg16: memref<1x128xf32, #tpu.memory_space<vmem>>, %arg17: memref<128x256xbf16, #tpu.memory_space<vmem>>, %arg18: memref<1x256xf32, #tpu.memory_space<vmem>>, %arg19: memref<256x256xbf16, #tpu.memory_space<vmem>>, %arg20: memref<1x256xf32, #tpu.memory_space<vmem>>, %arg21: memref<128x384xf32, #tpu.memory_space<vmem>>, %arg22: memref<128x256xf32, #tpu.memory_space<vmem>>) attributes {dimension_semantics = [#tpu.dimension_semantics<parallel>], iteration_bounds = array<i64: 2>, scalar_prefetch = 0 : i64, scratch_operands = 0 : i64, tpu.core_type = #tpu.core_type<tc>, window_params = [{transform_indices = @transform_0, window_bounds = array<i64: 128, 256>}, {transform_indices = @transform_1, window_bounds = array<i64: 128, 128>}, {pipeline_mode = #tpu.pipeline_mode<synchronous>, transform_indices = @transform_2, window_bounds = array<i64: 256, 256>}, {pipeline_mode = #tpu.pipeline_mode<synchronous>, transform_indices = @transform_3, window_bounds = array<i64: 1, 256>}, {pipeline_mode = #tpu.pipeline_mode<synchronous>, transform_indices = @transform_4, window_bounds = array<i64: 256, 128>}, {pipeline_mode = #tpu.pipeline_mode<synchronous>, transform_indices = @transform_5, window_bounds = array<i64: 1, 128>}, {pipeline_mode = #tpu.pipeline_mode<synchronous>, transform_indices = @transform_6, window_bounds = array<i64: 128, 64>}, {pipeline_mode = #tpu.pipeline_mode<synchronous>, transform_indices = @transform_7, window_bounds = array<i64: 1, 64>}, {pipeline_mode = #tpu.pipeline_mode<synchronous>, transform_indices = @transform_8, window_bounds = array<i64: 64, 256>}, {pipeline_mode = #tpu.pipeline_mode<synchronous>, transform_indices = @transform_9, window_bounds = array<i64: 1, 256>}, {pipeline_mode = #tpu.pipeline_mode<synchronous>, transform_indices = @transform_10, window_bounds = array<i64: 128, 128>}, {pipeline_mode = #tpu.pipeline_mode<synchronous>, transform_indices = @transform_11, window_bounds = array<i64: 1, 128>}, {pipeline_mode = #tpu.pipeline_mode<synchronous>, transform_indices = @transform_12, window_bounds = array<i64: 128, 64>}, {pipeline_mode = #tpu.pipeline_mode<synchronous>, transform_indices = @transform_13, window_bounds = array<i64: 1, 64>}, {pipeline_mode = #tpu.pipeline_mode<synchronous>, transform_indices = @transform_14, window_bounds = array<i64: 64, 128>}, {pipeline_mode = #tpu.pipeline_mode<synchronous>, transform_indices = @transform_15, window_bounds = array<i64: 1, 128>}, {pipeline_mode = #tpu.pipeline_mode<synchronous>, transform_indices = @transform_16, window_bounds = array<i64: 128, 256>}, {pipeline_mode = #tpu.pipeline_mode<synchronous>, transform_indices = @transform_17, window_bounds = array<i64: 1, 256>}, {pipeline_mode = #tpu.pipeline_mode<synchronous>, transform_indices = @transform_18, window_bounds = array<i64: 256, 256>}, {pipeline_mode = #tpu.pipeline_mode<synchronous>, transform_indices = @transform_19, window_bounds = array<i64: 1, 256>}, {transform_indices = @transform_20, window_bounds = array<i64: 128, 384>}, {transform_indices = @transform_21, window_bounds = array<i64: 128, 256>}]} {
    %c0 = arith.constant 0 : index
    %c0_0 = arith.constant 0 : index
    %0 = vector.load %arg1[%c0, %c0_0] : memref<128x256xbf16, #tpu.memory_space<vmem>>, vector<128x256xbf16>
    %c0_1 = arith.constant 0 : index
    %c0_2 = arith.constant 0 : index
    %1 = vector.load %arg3[%c0_1, %c0_2] : memref<256x256xbf16, #tpu.memory_space<vmem>>, vector<256x256xbf16>
    %cst = arith.constant dense<0.000000e+00> : vector<128x256xf32>
    %2 = tpu.matmul %0, %1, %cst {dimension_numbers = #tpu.dot_dimension_numbers<[1], [0], [0], [1], [0, 0, 1, 1], [], []>} : vector<128x256xbf16>, vector<256x256xbf16>, vector<128x256xf32> -> vector<128x256xf32>
    %c0_3 = arith.constant 0 : index
    %c0_4 = arith.constant 0 : index
    %3 = vector.load %arg4[%c0_3, %c0_4] : memref<1x256xf32, #tpu.memory_space<vmem>>, vector<1x256xf32>
    %4 = vector.broadcast %3 : vector<1x256xf32> to vector<128x256xf32>
    %5 = arith.addf %2, %4 : vector<128x256xf32>
    %cst_5 = arith.constant 0.000000e+00 : f32
    %6 = vector.broadcast %cst_5 : f32 to vector<128x256xf32>
    %7 = arith.maximumf %5, %6 : vector<128x256xf32>
    %8 = arith.truncf %7 : vector<128x256xf32> to vector<128x256xbf16>
    %c0_6 = arith.constant 0 : index
    %c0_7 = arith.constant 0 : index
    %9 = vector.load %arg5[%c0_6, %c0_7] : memref<256x128xbf16, #tpu.memory_space<vmem>>, vector<256x128xbf16>
    %cst_8 = arith.constant dense<0.000000e+00> : vector<128x128xf32>
    %10 = tpu.matmul %8, %9, %cst_8 {dimension_numbers = #tpu.dot_dimension_numbers<[1], [0], [0], [1], [0, 0, 1, 1], [], []>} : vector<128x256xbf16>, vector<256x128xbf16>, vector<128x128xf32> -> vector<128x128xf32>
    %c0_9 = arith.constant 0 : index
    %c0_10 = arith.constant 0 : index
    %11 = vector.load %arg6[%c0_9, %c0_10] : memref<1x128xf32, #tpu.memory_space<vmem>>, vector<1x128xf32>
    %12 = vector.broadcast %11 : vector<1x128xf32> to vector<128x128xf32>
    %13 = arith.addf %10, %12 : vector<128x128xf32>
    %cst_11 = arith.constant 0.000000e+00 : f32
    %14 = vector.broadcast %cst_11 : f32 to vector<128x128xf32>
    %15 = arith.maximumf %13, %14 : vector<128x128xf32>
    %16 = arith.truncf %15 : vector<128x128xf32> to vector<128x128xbf16>
    %c0_12 = arith.constant 0 : index
    %c0_13 = arith.constant 0 : index
    %17 = vector.load %arg7[%c0_12, %c0_13] : memref<128x64xbf16, #tpu.memory_space<vmem>>, vector<128x64xbf16>
    %cst_14 = arith.constant dense<0.000000e+00> : vector<128x64xf32>
    %18 = tpu.matmul %16, %17, %cst_14 {dimension_numbers = #tpu.dot_dimension_numbers<[1], [0], [0], [1], [0, 0, 1, 1], [], []>} : vector<128x128xbf16>, vector<128x64xbf16>, vector<128x64xf32> -> vector<128x64xf32>
    %c0_15 = arith.constant 0 : index
    %c0_16 = arith.constant 0 : index
    %19 = vector.load %arg8[%c0_15, %c0_16] : memref<1x64xf32, #tpu.memory_space<vmem>>, vector<1x64xf32>
    %20 = vector.broadcast %19 : vector<1x64xf32> to vector<128x64xf32>
    %21 = arith.addf %18, %20 : vector<128x64xf32>
    %cst_17 = arith.constant 0.000000e+00 : f32
    %22 = vector.broadcast %cst_17 : f32 to vector<128x64xf32>
    %23 = arith.maximumf %21, %22 : vector<128x64xf32>
    %24 = arith.truncf %23 : vector<128x64xf32> to vector<128x64xbf16>
    %c0_18 = arith.constant 0 : index
    %c0_19 = arith.constant 0 : index
    %25 = vector.load %arg9[%c0_18, %c0_19] : memref<64x256xbf16, #tpu.memory_space<vmem>>, vector<64x256xbf16>
    %cst_20 = arith.constant dense<0.000000e+00> : vector<128x256xf32>
    %26 = tpu.matmul %24, %25, %cst_20 {dimension_numbers = #tpu.dot_dimension_numbers<[1], [0], [0], [1], [0, 0, 1, 1], [], []>} : vector<128x64xbf16>, vector<64x256xbf16>, vector<128x256xf32> -> vector<128x256xf32>
    %c0_21 = arith.constant 0 : index
    %c0_22 = arith.constant 0 : index
    %27 = vector.load %arg10[%c0_21, %c0_22] : memref<1x256xf32, #tpu.memory_space<vmem>>, vector<1x256xf32>
    %28 = vector.broadcast %27 : vector<1x256xf32> to vector<128x256xf32>
    %29 = arith.addf %26, %28 : vector<128x256xf32>
    %30 = vector.extract_strided_slice %29 {offsets = [0, 0], sizes = [128, 128], strides = [1, 1]} : vector<128x256xf32> to vector<128x128xf32>
    %31 = vector.extract_strided_slice %29 {offsets = [0, 128], sizes = [128, 128], strides = [1, 1]} : vector<128x256xf32> to vector<128x128xf32>
    %c0_23 = arith.constant 0 : index
    %c0_24 = arith.constant 0 : index
    %32 = vector.load %arg2[%c0_23, %c0_24] : memref<128x128xf32, #tpu.memory_space<vmem>>, vector<128x128xf32>
    %33 = arith.mulf %32, %31 : vector<128x128xf32>
    %34 = arith.addf %30, %33 : vector<128x128xf32>
    %35 = arith.truncf %34 : vector<128x128xf32> to vector<128x128xbf16>
    %c0_25 = arith.constant 0 : index
    %c0_26 = arith.constant 0 : index
    %36 = vector.load %arg11[%c0_25, %c0_26] : memref<128x128xbf16, #tpu.memory_space<vmem>>, vector<128x128xbf16>
    %cst_27 = arith.constant dense<0.000000e+00> : vector<128x128xf32>
    %37 = tpu.matmul %35, %36, %cst_27 {dimension_numbers = #tpu.dot_dimension_numbers<[1], [0], [0], [1], [0, 0, 1, 1], [], []>} : vector<128x128xbf16>, vector<128x128xbf16>, vector<128x128xf32> -> vector<128x128xf32>
    %c0_28 = arith.constant 0 : index
    %c0_29 = arith.constant 0 : index
    %38 = vector.load %arg12[%c0_28, %c0_29] : memref<1x128xf32, #tpu.memory_space<vmem>>, vector<1x128xf32>
    %39 = vector.broadcast %38 : vector<1x128xf32> to vector<128x128xf32>
    %40 = arith.addf %37, %39 : vector<128x128xf32>
    %cst_30 = arith.constant 0.000000e+00 : f32
    %41 = vector.broadcast %cst_30 : f32 to vector<128x128xf32>
    %42 = arith.maximumf %40, %41 : vector<128x128xf32>
    %43 = arith.truncf %42 : vector<128x128xf32> to vector<128x128xbf16>
    %c0_31 = arith.constant 0 : index
    %c0_32 = arith.constant 0 : index
    %44 = vector.load %arg13[%c0_31, %c0_32] : memref<128x64xbf16, #tpu.memory_space<vmem>>, vector<128x64xbf16>
    %cst_33 = arith.constant dense<0.000000e+00> : vector<128x64xf32>
    %45 = tpu.matmul %43, %44, %cst_33 {dimension_numbers = #tpu.dot_dimension_numbers<[1], [0], [0], [1], [0, 0, 1, 1], [], []>} : vector<128x128xbf16>, vector<128x64xbf16>, vector<128x64xf32> -> vector<128x64xf32>
    %c0_34 = arith.constant 0 : index
    %c0_35 = arith.constant 0 : index
    %46 = vector.load %arg14[%c0_34, %c0_35] : memref<1x64xf32, #tpu.memory_space<vmem>>, vector<1x64xf32>
    %47 = vector.broadcast %46 : vector<1x64xf32> to vector<128x64xf32>
    %48 = arith.addf %45, %47 : vector<128x64xf32>
    %cst_36 = arith.constant 0.000000e+00 : f32
    %49 = vector.broadcast %cst_36 : f32 to vector<128x64xf32>
    %50 = arith.maximumf %48, %49 : vector<128x64xf32>
    %51 = arith.truncf %50 : vector<128x64xf32> to vector<128x64xbf16>
    %c0_37 = arith.constant 0 : index
    %c0_38 = arith.constant 0 : index
    %52 = vector.load %arg15[%c0_37, %c0_38] : memref<64x128xbf16, #tpu.memory_space<vmem>>, vector<64x128xbf16>
    %cst_39 = arith.constant dense<0.000000e+00> : vector<128x128xf32>
    %53 = tpu.matmul %51, %52, %cst_39 {dimension_numbers = #tpu.dot_dimension_numbers<[1], [0], [0], [1], [0, 0, 1, 1], [], []>} : vector<128x64xbf16>, vector<64x128xbf16>, vector<128x128xf32> -> vector<128x128xf32>
    %c0_40 = arith.constant 0 : index
    %c0_41 = arith.constant 0 : index
    %54 = vector.load %arg16[%c0_40, %c0_41] : memref<1x128xf32, #tpu.memory_space<vmem>>, vector<1x128xf32>
    %55 = vector.broadcast %54 : vector<1x128xf32> to vector<128x128xf32>
    %56 = arith.addf %53, %55 : vector<128x128xf32>
    %cst_42 = arith.constant 0.000000e+00 : f32
    %57 = vector.broadcast %cst_42 : f32 to vector<128x128xf32>
    %58 = arith.maximumf %56, %57 : vector<128x128xf32>
    %59 = arith.truncf %58 : vector<128x128xf32> to vector<128x128xbf16>
    %c0_43 = arith.constant 0 : index
    %c0_44 = arith.constant 0 : index
    %60 = vector.load %arg17[%c0_43, %c0_44] : memref<128x256xbf16, #tpu.memory_space<vmem>>, vector<128x256xbf16>
    %cst_45 = arith.constant dense<0.000000e+00> : vector<128x256xf32>
    %61 = tpu.matmul %59, %60, %cst_45 {dimension_numbers = #tpu.dot_dimension_numbers<[1], [0], [0], [1], [0, 0, 1, 1], [], []>} : vector<128x128xbf16>, vector<128x256xbf16>, vector<128x256xf32> -> vector<128x256xf32>
    %c0_46 = arith.constant 0 : index
    %c0_47 = arith.constant 0 : index
    %62 = vector.load %arg18[%c0_46, %c0_47] : memref<1x256xf32, #tpu.memory_space<vmem>>, vector<1x256xf32>
    %63 = vector.broadcast %62 : vector<1x256xf32> to vector<128x256xf32>
    %64 = arith.addf %61, %63 : vector<128x256xf32>
    %cst_48 = arith.constant 0.000000e+00 : f32
    %65 = vector.broadcast %cst_48 : f32 to vector<128x256xf32>
    %66 = arith.maximumf %64, %65 : vector<128x256xf32>
    %67 = arith.truncf %66 : vector<128x256xf32> to vector<128x256xbf16>
    %c0_49 = arith.constant 0 : index
    %c0_50 = arith.constant 0 : index
    %68 = vector.load %arg19[%c0_49, %c0_50] : memref<256x256xbf16, #tpu.memory_space<vmem>>, vector<256x256xbf16>
    %cst_51 = arith.constant dense<0.000000e+00> : vector<128x256xf32>
    %69 = tpu.matmul %67, %68, %cst_51 {dimension_numbers = #tpu.dot_dimension_numbers<[1], [0], [0], [1], [0, 0, 1, 1], [], []>} : vector<128x256xbf16>, vector<256x256xbf16>, vector<128x256xf32> -> vector<128x256xf32>
    %c0_52 = arith.constant 0 : index
    %c0_53 = arith.constant 0 : index
    %70 = vector.load %arg20[%c0_52, %c0_53] : memref<1x256xf32, #tpu.memory_space<vmem>>, vector<1x256xf32>
    %71 = vector.broadcast %70 : vector<1x256xf32> to vector<128x256xf32>
    %72 = arith.addf %69, %71 : vector<128x256xf32>
    %cst_54 = arith.constant 5.000000e-01 : f32
    %73 = vector.broadcast %cst_54 : f32 to vector<128x256xf32>
    %74 = arith.mulf %73, %72 : vector<128x256xf32>
    %75 = math.tanh %74 : vector<128x256xf32>
    %cst_55 = arith.constant 1.000000e+00 : f32
    %76 = vector.broadcast %cst_55 : f32 to vector<128x256xf32>
    %77 = arith.addf %75, %76 : vector<128x256xf32>
    %cst_56 = arith.constant 5.000000e-01 : f32
    %78 = vector.broadcast %cst_56 : f32 to vector<128x256xf32>
    %79 = arith.mulf %78, %77 : vector<128x256xf32>
    %c0_57 = arith.constant 0 : index
    %c0_58 = arith.constant 0 : index
    %80 = vector.load %arg22[%c0_57, %c0_58] : memref<128x256xf32, #tpu.memory_space<vmem>>, vector<128x256xf32>
    tpu.vector_store %arg22[%c0_57, %c0_58], %79 {strides = array<i32>} : memref<128x256xf32, #tpu.memory_space<vmem>>, vector<128x256xf32>,
    %c0_59 = arith.constant 0 : index
    %c0_60 = arith.constant 0 : index
    %81 = vector.load %arg21[%c0_59, %c0_60] : memref<128x384xf32, #tpu.memory_space<vmem>>, vector<128x128xf32>
    tpu.vector_store %arg21[%c0_59, %c0_60], %30 {strides = array<i32>} : memref<128x384xf32, #tpu.memory_space<vmem>>, vector<128x128xf32>,
    %c0_61 = arith.constant 0 : index
    %c128 = arith.constant 128 : index
    %82 = vector.load %arg21[%c0_61, %c128] : memref<128x384xf32, #tpu.memory_space<vmem>>, vector<128x128xf32>
    tpu.vector_store %arg21[%c0_61, %c128], %31 {strides = array<i32>} : memref<128x384xf32, #tpu.memory_space<vmem>>, vector<128x128xf32>,
    %c0_62 = arith.constant 0 : index
    %c256 = arith.constant 256 : index
    %83 = vector.load %arg21[%c0_62, %c256] : memref<128x384xf32, #tpu.memory_space<vmem>>, vector<128x128xf32>
    tpu.vector_store %arg21[%c0_62, %c256], %34 {strides = array<i32>} : memref<128x384xf32, #tpu.memory_space<vmem>>, vector<128x128xf32>,
    return
  }
  func.func @transform_0(%arg0: i32) -> (i32, i32) {
    %c0_i32 = arith.constant 0 : i32
    %c0_i32_0 = arith.constant 0 : i32
    return %arg0, %c0_i32 : i32, i32
  }
  func.func @transform_1(%arg0: i32) -> (i32, i32) {
    %c0_i32 = arith.constant 0 : i32
    %c0_i32_0 = arith.constant 0 : i32
    return %arg0, %c0_i32 : i32, i32
  }
  func.func @transform_2(%arg0: i32) -> (i32, i32) {
    %c0_i32 = arith.constant 0 : i32
    %c0_i32_0 = arith.constant 0 : i32
    %c0_i32_1 = arith.constant 0 : i32
    return %c0_i32, %c0_i32_0 : i32, i32
  }
  func.func @transform_3(%arg0: i32) -> (i32, i32) {
    %c0_i32 = arith.constant 0 : i32
    %c0_i32_0 = arith.constant 0 : i32
    %c0_i32_1 = arith.constant 0 : i32
    return %c0_i32, %c0_i32_0 : i32, i32
  }
  func.func @transform_4(%arg0: i32) -> (i32, i32) {
    %c0_i32 = arith.constant 0 : i32
    %c0_i32_0 = arith.constant 0 : i32
    %c0_i32_1 = arith.constant 0 : i32
    return %c0_i32, %c0_i32_0 : i32, i32
  }
  func.func @transform_5(%arg0: i32) -> (i32, i32) {
    %c0_i32 = arith.constant 0 : i32
    %c0_i32_0 = arith.constant 0 : i32
    %c0_i32_1 = arith.constant 0 : i32
    return %c0_i32, %c0_i32_0 : i32, i32
  }
  func.func @transform_6(%arg0: i32) -> (i32, i32) {
    %c0_i32 = arith.constant 0 : i32
    %c0_i32_0 = arith.constant 0 : i32
    %c0_i32_1 = arith.constant 0 : i32
    return %c0_i32, %c0_i32_0 : i32, i32
  }
  func.func @transform_7(%arg0: i32) -> (i32, i32) {
    %c0_i32 = arith.constant 0 : i32
    %c0_i32_0 = arith.constant 0 : i32
    %c0_i32_1 = arith.constant 0 : i32
    return %c0_i32, %c0_i32_0 : i32, i32
  }
  func.func @transform_8(%arg0: i32) -> (i32, i32) {
    %c0_i32 = arith.constant 0 : i32
    %c0_i32_0 = arith.constant 0 : i32
    %c0_i32_1 = arith.constant 0 : i32
    return %c0_i32, %c0_i32_0 : i32, i32
  }
  func.func @transform_9(%arg0: i32) -> (i32, i32) {
    %c0_i32 = arith.constant 0 : i32
    %c0_i32_0 = arith.constant 0 : i32
    %c0_i32_1 = arith.constant 0 : i32
    return %c0_i32, %c0_i32_0 : i32, i32
  }
  func.func @transform_10(%arg0: i32) -> (i32, i32) {
    %c0_i32 = arith.constant 0 : i32
    %c0_i32_0 = arith.constant 0 : i32
    %c0_i32_1 = arith.constant 0 : i32
    return %c0_i32, %c0_i32_0 : i32, i32
  }
  func.func @transform_11(%arg0: i32) -> (i32, i32) {
    %c0_i32 = arith.constant 0 : i32
    %c0_i32_0 = arith.constant 0 : i32
    %c0_i32_1 = arith.constant 0 : i32
    return %c0_i32, %c0_i32_0 : i32, i32
  }
  func.func @transform_12(%arg0: i32) -> (i32, i32) {
    %c0_i32 = arith.constant 0 : i32
    %c0_i32_0 = arith.constant 0 : i32
    %c0_i32_1 = arith.constant 0 : i32
    return %c0_i32, %c0_i32_0 : i32, i32
  }
  func.func @transform_13(%arg0: i32) -> (i32, i32) {
    %c0_i32 = arith.constant 0 : i32
    %c0_i32_0 = arith.constant 0 : i32
    %c0_i32_1 = arith.constant 0 : i32
    return %c0_i32, %c0_i32_0 : i32, i32
  }
  func.func @transform_14(%arg0: i32) -> (i32, i32) {
    %c0_i32 = arith.constant 0 : i32
    %c0_i32_0 = arith.constant 0 : i32
    %c0_i32_1 = arith.constant 0 : i32
    return %c0_i32, %c0_i32_0 : i32, i32
  }
  func.func @transform_15(%arg0: i32) -> (i32, i32) {
    %c0_i32 = arith.constant 0 : i32
    %c0_i32_0 = arith.constant 0 : i32
    %c0_i32_1 = arith.constant 0 : i32
    return %c0_i32, %c0_i32_0 : i32, i32
  }
  func.func @transform_16(%arg0: i32) -> (i32, i32) {
    %c0_i32 = arith.constant 0 : i32
    %c0_i32_0 = arith.constant 0 : i32
    %c0_i32_1 = arith.constant 0 : i32
    return %c0_i32, %c0_i32_0 : i32, i32
  }
  func.func @transform_17(%arg0: i32) -> (i32, i32) {
    %c0_i32 = arith.constant 0 : i32
    %c0_i32_0 = arith.constant 0 : i32
    %c0_i32_1 = arith.constant 0 : i32
    return %c0_i32, %c0_i32_0 : i32, i32
  }
  func.func @transform_18(%arg0: i32) -> (i32, i32) {
    %c0_i32 = arith.constant 0 : i32
    %c0_i32_0 = arith.constant 0 : i32
    %c0_i32_1 = arith.constant 0 : i32
    return %c0_i32, %c0_i32_0 : i32, i32
  }
  func.func @transform_19(%arg0: i32) -> (i32, i32) {
    %c0_i32 = arith.constant 0 : i32
    %c0_i32_0 = arith.constant 0 : i32
    %c0_i32_1 = arith.constant 0 : i32
    return %c0_i32, %c0_i32_0 : i32, i32
  }
  func.func @transform_20(%arg0: i32) -> (i32, i32) {
    %c0_i32 = arith.constant 0 : i32
    %c0_i32_0 = arith.constant 0 : i32
    return %arg0, %c0_i32 : i32, i32
  }
  func.func @transform_21(%arg0: i32) -> (i32, i32) {
    %c0_i32 = arith.constant 0 : i32
    %c0_i32_0 = arith.constant 0 : i32
    return %arg0, %c0_i32 : i32, i32
  }
}

</mosaic_0001>

<bundles_post_ra>
// kernel: vae_forward.1
= control target key start
LH: loop header
LB: loop body
LE: loop exit
PB: predicated region body
PF: predicated region fallthrough
CT: control target
= control target key end

     0   :  { %s4971_s0 = inlined_call_operand.vmem [shape: bf16[256,256], index: 0, kind: input, shape index: {}]   ;;  %s4972_s1 = inlined_call_operand.vmem [shape: f32[256,128], index: 1, kind: input, shape index: {}]   ;;  %s4973_s2 = inlined_call_operand.vmem [shape: bf16[256,256], index: 2, kind: input, shape index: {}]   ;;  %s4974_s3 = inlined_call_operand.vmem [shape: f32[1,256], index: 3, kind: input, shape index: {}]   ;;  %s4975_s4 = inlined_call_operand.vmem [shape: bf16[256,128], index: 4, kind: input, shape index: {}]   ;;  %s4976_s5 = inlined_call_operand.vmem [shape: f32[1,128], index: 5, kind: input, shape index: {}]   ;;  %s4977_s6 = inlined_call_operand.vmem [shape: bf16[128,64], index: 6, kind: input, shape index: {}]   ;;  %s4978_s7 = inlined_call_operand.vmem [shape: f32[1,64], index: 7, kind: input, shape index: {}]   ;;  %s4979_s8 = inlined_call_operand.vmem [shape: bf16[64,256], index: 8, kind: input, shape index: {}]   ;;  %s4980_s9 = inlined_call_operand.vmem [shape: f32[1,256], index: 9, kind: input, shape index: {}]   ;;  %s4981_s10 = inlined_call_operand.vmem [shape: bf16[128,128], index: 10, kind: input, shape index: {}]   ;;  %s4982_s11 = inlined_call_operand.vmem [shape: f32[1,128], index: 11, kind: input, shape index: {}]   ;;  %s4983_s12 = inlined_call_operand.vmem [shape: bf16[128,64], index: 12, kind: input, shape index: {}]   ;;  %s4984_s13 = inlined_call_operand.vmem [shape: f32[1,64], index: 13, kind: input, shape index: {}]   ;;  %s4985_s14 = inlined_call_operand.vmem [shape: bf16[64,128], index: 14, kind: input, shape index: {}]   ;;  %s4986_s15 = inlined_call_operand.vmem [shape: f32[1,128], index: 15, kind: input, shape index: {}]   ;;  %s4987_s16 = inlined_call_operand.vmem [shape: bf16[128,256], index: 16, kind: input, shape index: {}]   ;;  %s4988_s17 = inlined_call_operand.vmem [shape: f32[1,256], index: 17, kind: input, shape index: {}]   ;;  %s4989_s18 = inlined_call_operand.vmem [shape: bf16[256,256], index: 18, kind: input, shape index: {}]   ;;  %s4990_s19 = inlined_call_operand.vmem [shape: f32[1,256], index: 19, kind: input, shape index: {}]   ;;  %s4991_s20 = inlined_call_operand.vmem [shape: f32[256,384], index: 20, kind: output, shape index: {0}]   ;;  %s4992_s21 = inlined_call_operand.vmem [shape: f32[256,256], index: 21, kind: output, shape index: {1}]  }
   0x1   :  { %4997 = sst [smem:[#allocation3_spill]] %s4971_s0 }
   0x2   :  { %4998 = sst [smem:[#allocation4_spill]] %s4972_s1 }
   0x3   :  { %4999 = sst [smem:[#allocation5_spill]] %s4973_s2  ;;  %s4168_s2 = smov 0  }
   0x4   :  { %5000 = sst [smem:[#allocation6_spill]] %s4974_s3 }
   0x5   :  { %5001 = sst [smem:[#allocation7_spill]] %s4975_s4 }
   0x6   :  { %5002 = sst [smem:[#allocation8_spill]] %s4976_s5 }
   0x7 LB: > { %5003 = sst [smem:[#allocation2_spill]] %s4055_s2  ;;  %s3335_s25 = sadd.s32 4294967295, %s4055_s2   ;;  %s4055_s2 = sphi %s4168_s2, %s32_s2  }
   0x8   : > { %p3339_p0 = scmp.ge.s32.totalorder %s4055_s2, 1  ;;  %p603_p1 = scmp.lt.s32.totalorder %s4055_s2, 3 }
   0xa   : > { %p604_p2 = pnand %p3339_p0, %p603_p1 }
   0xb   : > { %s5004_s3 = sld [smem:[#allocation5_spill]] (!%p604_p2)  ;;  %s3340_s1 = sshll.u32 (!%p604_p2), %s3335_s25, 4  ;;  %vm1673_vm0 = vcmask (!%p604_p2), 523264  }
   0xc   : > { %607 = sbr.rel (%p604_p2) target bundleno = 2165 (0x875), region = 100  ;;  %p677_p3 = scmp.lt.s32.totalorder (!%p604_p2), %s3340_s1, 31 }
   0xd   : > { %s5005_s0 = sld [smem:[#allocation3_spill]] (!%p604_p2)  ;;  %s5008_s28 = sld [smem:[#allocation8_spill]] (!%p604_p2) }
  0x11   : > { %v3785_v0 = vld [vmem:[%s5004_s3 + $0x4] ss:$8 sps:$4 sm:$0xff] (!%p604_p2)   ;;  %v3787_v1 = vld [vmem:[%s5004_s3] ss:$8 sps:$4 sm:$0xff] (!%p604_p2)   ;;  %v3788_v2 = vld [vmem:[%s5004_s3 + $0x14] ss:$8 sps:$4 sm:$0xff] (!%p604_p2)  }
  0x12   : > { %1004 = vmatprep.subr.bf16.mxu0 (!%p604_p2), %v3785_v0  ;;  %v3790_v3 = vld [vmem:[%s5004_s3 + $0x10] ss:$8 sps:$4 sm:$0xff] (!%p604_p2)   ;;  %v3791_v4 = vld [vmem:[%s5004_s3 + $0x24] ss:$8 sps:$4 sm:$0xff] (!%p604_p2)   ;;  %v3793_v5 = vld [vmem:[%s5004_s3 + $0x20] ss:$8 sps:$4 sm:$0xff] (!%p604_p2)  }
  0x13   : > { %1005 = vmatpush1.bf16.msra.mxu0 %v3787_v1  ;;  %v3794_v6 = vld [vmem:[%s5004_s3 + $0x34] ss:$8 sps:$4 sm:$0xff]   ;;  %v3796_v7 = vld [vmem:[%s5004_s3 + $0x30] ss:$8 sps:$4 sm:$0xff]   ;;  %v3797_v8 = vld [vmem:[%s5004_s3 + $0x44] ss:$8 sps:$4 sm:$0xff]   ;;  %v754_v1 = vlaneseq }
  0x14   : > { %1006 = vmatprep.subr.bf16.mxu0 %v3788_v2  ;;  %s5013_s1 = smov (!%p677_p3, %s3340_s1), 31  ;;  %v3799_v9 = vld [vmem:[%s5004_s3 + $0x40] ss:$8 sps:$4 sm:$0xff]   ;;  %v3800_v10 = vld [vmem:[%s5004_s3 + $0x54] ss:$8 sps:$4 sm:$0xff]  }
  0x15   : > { %s4995_s24 = sshll.u32 %s5013_s1, 3  ;;  %v3802_v11 = vld [vmem:[%s5004_s3 + $0x50] ss:$8 sps:$4 sm:$0xff]   ;;  %v3803_v12 = vld [vmem:[%s5004_s3 + $0x64] ss:$8 sps:$4 sm:$0xff]   ;;  %v755_v2 = vshrl.u32 %v754_v1, 7 }
  0x16   : > { %s4220_s4 = scalar_lea.vmem %s5005_s0, %s4995_s24  ;;  %v3805_v14 = vld [vmem:[%s5004_s3 + $0x60] ss:$8 sps:$4 sm:$0xff]   ;;  %v3806_v15 = vld [vmem:[%s5004_s3 + $0x74] ss:$8 sps:$4 sm:$0xff]   ;;  %v3808_v16 = vld [vmem:[%s5004_s3 + $0x70] ss:$8 sps:$4 sm:$0xff]  }
  0x17   : > { %1007 = vmatpush1.bf16.msra.mxu0 %v3790_v3  ;;  %v3835_v13 = vld [vmem:[%s4220_s4 + $0x4] ss:$8 sps:$4 sm:$0xff]   ;;  %v3811_v18 = vld [vmem:[%s5004_s3 + $0x80] ss:$8 sps:$4 sm:$0xff]   ;;  %v3812_v19 = vld [vmem:[%s5004_s3 + $0x94] ss:$8 sps:$4 sm:$0xff]  }
  0x18   : > { %1008 = vmatprep.subr.bf16.mxu0 %v3791_v4  ;;  %1036 = vmatprep.mubr.bf16.mxu0 %v3835_v13  ;;  %v3809_v17 = vld [vmem:[%s5004_s3 + $0x84] ss:$8 sps:$4 sm:$0xff]   ;;  %s5006_s24 = sld [smem:[#allocation7_spill]]  ;;  %v3814_v21 = vld [vmem:[%s5004_s3 + $0x90] ss:$8 sps:$4 sm:$0xff]   ;;  %v4349_v3 = vsub.s32 0, %v755_v2 }
  0x19   : > { %v3815_v23 = vld [vmem:[%s5004_s3 + $0xa4] ss:$8 sps:$4 sm:$0xff]   ;;  %v3817_v27 = vld [vmem:[%s5004_s3 + $0xa0] ss:$8 sps:$4 sm:$0xff]   ;;  %v3818_v28 = vld [vmem:[%s5004_s3 + $0xb4] ss:$8 sps:$4 sm:$0xff]  }
  0x1a   : > { %v3820_v31 = vld [vmem:[%s5004_s3 + $0xb0] ss:$8 sps:$4 sm:$0xff]   ;;  %v3821_v32 = vld [vmem:[%s5004_s3 + $0xc4] ss:$8 sps:$4 sm:$0xff]   ;;  %v3823_v35 = vld [vmem:[%s5004_s3 + $0xc0] ss:$8 sps:$4 sm:$0xff]  }
  0x1b   : > { %1009 = vmatpush1.bf16.msra.mxu0 %v3793_v5  ;;  %v3824_v37 = vld [vmem:[%s5004_s3 + $0xd4] ss:$8 sps:$4 sm:$0xff]   ;;  %v3826_v39 = vld [vmem:[%s5004_s3 + $0xd0] ss:$8 sps:$4 sm:$0xff]   ;;  %v3827_v40 = vld [vmem:[%s5004_s3 + $0xe4] ss:$8 sps:$4 sm:$0xff]  }
  0x1c   : > { %1010 = vmatprep.subr.bf16.mxu0 %v3794_v6  ;;  %v3829_v41 = vld [vmem:[%s5004_s3 + $0xe0] ss:$8 sps:$4 sm:$0xff]   ;;  %v3830_v42 = vld [vmem:[%s5004_s3 + $0xf4] ss:$8 sps:$4 sm:$0xff]   ;;  %v3832_v43 = vld [vmem:[%s5004_s3 + $0xf0] ss:$8 sps:$4 sm:$0xff]  }
  0x1d   : > { %v3833_v44 = vld [vmem:[%s4220_s4] ss:$8 sps:$4 sm:$0xff]   ;;  %v3836_v45 = vld [vmem:[%s4220_s4 + $0x14] ss:$8 sps:$4 sm:$0xff]   ;;  %v3838_v46 = vld [vmem:[%s4220_s4 + $0x10] ss:$8 sps:$4 sm:$0xff]  }
  0x1e   : > { %v3857_v20 = vld [vmem:[%s5006_s24 + $0x40] sm:$0xff]   ;;  %v3859_v24 = vld [vmem:[%s5006_s24 + $0x48] sm:$0xff]   ;;  %v3861_v26 = vld [vmem:[%s5006_s24 + $0x50] sm:$0xff]   ;;  %s5007_s0 = sld [smem:[#allocation6_spill]]  ;;  %v4354_v5 = vsub.s32 1, %v755_v2  ;;  %s3775_s27 = smul.u32 24, %s5013_s1 }
  0x1f   : > { %1011 = vmatpush1.bf16.msra.mxu0 %v3796_v7  ;;  %v3858_v22 = vld [vmem:[%s5006_s24] sm:$0xff]   ;;  %3523 = vmatprep.subr.bf16.mxu1 %v3857_v20  ;;  %v3860_v25 = vld [vmem:[%s5006_s24 + $0x8] sm:$0xff]   ;;  %v3862_v29 = vld [vmem:[%s5006_s24 + $0x10] sm:$0xff]   ;;  %s3522_s25 = sshll.u32 %s5013_s1, 4 }
  0x20   : > { %1012 = vmatprep.subr.bf16.mxu0 %v3797_v8  ;;  %3524 = vmatpush3.bf16.msra.mxu1 %v3858_v22  ;;  %v3863_v30 = vld [vmem:[%s5006_s24 + $0x58] sm:$0xff]   ;;  %v3865_v34 = vld [vmem:[%s5006_s24 + $0x60] sm:$0xff]   ;;  %v3867_v38 = vld [vmem:[%s5006_s24 + $0x68] sm:$0xff]   ;;  %s4547_s22 = scalar_lea.vmem %s4991_s20, %s3775_s27 }
  0x21   : > { %3525 = vmatprep.subr.bf16.mxu1 %v3859_v24  ;;  %v3864_v33 = vld [vmem:[%s5006_s24 + $0x18] sm:$0xff]   ;;  %v3866_v36 = vld [vmem:[%s5006_s24 + $0x20] sm:$0xff]   ;;  %v3868_v59 = vld [vmem:[%s5006_s24 + $0x28] sm:$0xff]  }
  0x22   : > { %v3839_v47 = vld [vmem:[%s4220_s4 + $0x24] ss:$8 sps:$4 sm:$0xff]   ;;  %v3841_v48 = vld [vmem:[%s4220_s4 + $0x20] ss:$8 sps:$4 sm:$0xff]   ;;  %v3842_v49 = vld [vmem:[%s4220_s4 + $0x34] ss:$8 sps:$4 sm:$0xff]  }
  0x23   : > { %1013 = vmatpush1.bf16.msra.mxu0 %v3799_v9  ;;  %v3844_v50 = vld [vmem:[%s4220_s4 + $0x30] ss:$8 sps:$4 sm:$0xff]   ;;  %v3845_v51 = vld [vmem:[%s4220_s4 + $0x44] ss:$8 sps:$4 sm:$0xff]   ;;  %v3847_v52 = vld [vmem:[%s4220_s4 + $0x40] ss:$8 sps:$4 sm:$0xff]  }
  0x24   : > { %1014 = vmatprep.subr.bf16.mxu0 %v3800_v10  ;;  %3526 = vmatpush3.bf16.msra.mxu1 %v3860_v25  ;;  %v3848_v53 = vld [vmem:[%s4220_s4 + $0x54] ss:$8 sps:$4 sm:$0xff]   ;;  %v3850_v54 = vld [vmem:[%s4220_s4 + $0x50] ss:$8 sps:$4 sm:$0xff]   ;;  %v3851_v55 = vld [vmem:[%s4220_s4 + $0x64] ss:$8 sps:$4 sm:$0xff]  }
  0x25   : > { %3527 = vmatprep.subr.bf16.mxu1 %v3861_v26  ;;  %v3853_v56 = vld [vmem:[%s4220_s4 + $0x60] ss:$8 sps:$4 sm:$0xff]   ;;  %v3854_v57 = vld [vmem:[%s4220_s4 + $0x74] ss:$8 sps:$4 sm:$0xff]   ;;  %v3856_v58 = vld [vmem:[%s4220_s4 + $0x70] ss:$8 sps:$4 sm:$0xff]   ;;  %s4910_s4 = scalar_lea.vmem %s4992_s21, %s3522_s25 }
  0x26   : > { %v3869_v60 = vld [vmem:[%s5006_s24 + $0x70] sm:$0xff]   ;;  %v3871_v62 = vld [vmem:[%s5006_s24 + $0x78] sm:$0xff]   ;;  %v3873_v0 = vld [vmem:[%s4977_s6] sm:$0xff]  }
  0x27   : > { %1015 = vmatpush1.bf16.msra.mxu0 %v3802_v11  ;;  %v3870_v61 = vld [vmem:[%s5006_s24 + $0x30] sm:$0xff]   ;;  %v3872_v63 = vld [vmem:[%s5006_s24 + $0x38] sm:$0xff]   ;;  %v752_v4 = vld [vmem:[%s5007_s0] sm:$0x3]  ;;  %s5010_s0 = sld [smem:[#allocation4_spill]] }
  0x28   : > { %1016 = vmatprep.subr.bf16.mxu0 %v3803_v12  ;;  %3528 = vmatpush3.bf16.msra.mxu1 %v3862_v29  ;;  %v4357_v6 = vrot.slane %v752_v4, %v4349_v3  ;;  %v4360_v7 = vrot.slane %v752_v4, %v4354_v5  ;;  %v3874_v25 = vld [vmem:[%s4977_s6 + $0x8] sm:$0xff]  }
  0x29   : > { %3529 = vmatprep.subr.bf16.mxu1 %v3863_v30 }
  0x2b   : > { %1017 = vmatpush1.bf16.msra.mxu0 %v3805_v14 }
  0x2c   : > { %1018 = vmatprep.subr.bf16.mxu0 %v3806_v15  ;;  %3530 = vmatpush3.bf16.msra.mxu1 %v3864_v33  ;;  %v3875_v33 = vld [vmem:[%s4977_s6 + $0x10] sm:$0xff]  }
  0x2d   : > { %3531 = vmatprep.subr.bf16.mxu1 %v3865_v34 }
  0x2f   : > { %1019 = vmatpush1.bf16.msra.mxu0 %v3808_v16 }
  0x30   : > { %1020 = vmatprep.subr.bf16.mxu0 %v3809_v17  ;;  %3532 = vmatpush3.bf16.msra.mxu1 %v3866_v36 }
  0x31   : > { %3533 = vmatprep.subr.bf16.mxu1 %v3867_v38 }
  0x33   : > { %1021 = vmatpush1.bf16.msra.mxu0 %v3811_v18 }
  0x34   : > { %1022 = vmatprep.subr.bf16.mxu0 %v3812_v19  ;;  %3534 = vmatpush3.bf16.msra.mxu1 %v3868_v59 }
  0x35   : > { %3535 = vmatprep.subr.bf16.mxu1 %v3869_v60 }
  0x37   : > { %1023 = vmatpush1.bf16.msra.mxu0 %v3814_v21 }
  0x38   : > { %1024 = vmatprep.subr.bf16.mxu0 %v3815_v23  ;;  %3536 = vmatpush3.bf16.msra.mxu1 %v3870_v61 }
  0x39   : > { %3537 = vmatprep.subr.bf16.mxu1 %v3871_v62 }
  0x3b   : > { %1025 = vmatpush1.bf16.msra.mxu0 %v3817_v27 }
  0x3c   : > { %1026 = vmatprep.subr.bf16.mxu0 %v3818_v28  ;;  %3538 = vmatpush3.bf16.msra.mxu1 %v3872_v63 }
  0x3d   : > { %3647 = vmatprep.subr.bf16.mxu1 %v3873_v0 }
  0x3f   : > { %1027 = vmatpush1.bf16.msra.mxu0 %v3820_v31 }
  0x40   : > { %1028 = vmatprep.subr.bf16.mxu0 %v3821_v32 }
  0x43   : > { %1029 = vmatpush1.bf16.msra.mxu0 %v3823_v35 }
  0x44   : > { %1030 = vmatprep.subr.bf16.mxu0 %v3824_v37 }
  0x47   : > { %1031 = vmatpush1.bf16.msra.mxu0 %v3826_v39 }
  0x48   : > { %1032 = vmatprep.subr.bf16.mxu0 %v3827_v40 }
  0x4b   : > { %1033 = vmatpush1.bf16.msra.mxu0 %v3829_v41  ;;  %v3876_v41 = vld [vmem:[%s4977_s6 + $0x18] sm:$0xff]  }
  0x4c   : > { %1034 = vmatprep.subr.bf16.mxu0 %v3830_v42 }
  0x4f   : > { %1035 = vmatpush1.bf16.msra.mxu0 %v3832_v43 }
  0x52   : > { %1037 = vmatmul.mubr.bf16.vlgmr.msra.gmra.mrb[0].mxu0 %v3833_v44 }
  0x53   : > { %1046 = vmatprep.mubr.bf16.mxu0 %v3836_v45 }
  0x5a   : > { %1047 = vmatmul.mubr.bf16.gmra.mrb[4].mxu0 %v3838_v46 }
  0x5b   : > { %1056 = vmatprep.mubr.bf16.mxu0 %v3839_v47 }
  0x62   : > { %1057 = vmatmul.mubr.bf16.gmra.mrb[8].mxu0 %v3841_v48 }
  0x63   : > { %1066 = vmatprep.mubr.bf16.mxu0 %v3842_v49  ;;  %v3877_v49 = vld [vmem:[%s4977_s6 + $0x20] sm:$0xff]  }
  0x6a   : > { %1067 = vmatmul.mubr.bf16.gmra.mrb[12].mxu0 %v3844_v50 }
  0x6b   : > { %1076 = vmatprep.mubr.bf16.mxu0 %v3845_v51 }
  0x72   : > { %1077 = vmatmul.mubr.bf16.gmra.mrb[16].mxu0 %v3847_v52 }
  0x73   : > { %1086 = vmatprep.mubr.bf16.mxu0 %v3848_v53 }
  0x7a   : > { %1087 = vmatmul.mubr.bf16.gmra.mrb[20].mxu0 %v3850_v54 }
  0x7b   : > { %1096 = vmatprep.mubr.bf16.mxu0 %v3851_v55 }
  0x82   : > { %1097 = vmatmul.mubr.bf16.gmra.mrb[24].mxu0 %v3853_v56 }
  0x83   : > { %1106 = vmatprep.mubr.bf16.mxu0 %v3854_v57  ;;  %v3878_v57 = vld [vmem:[%s4977_s6 + $0x28] sm:$0xff]  }
  0x8a   : > { %1107 = vmatmul.mubr.bf16.gmra.mrb[28].mxu0 %v3856_v58 }
 0x125   : > { %v1038_v8 = vpop.f32.mrb[0].mxu0 }
 0x126   : > { %v1039_v9 = vadd.f32 %v1038_v8, %v4357_v6  ;;  %v1040_v10 = vpop.f32.mrb[1].mxu0 }
 0x127   : > { %v1041_v11 = vadd.f32 %v1040_v10, %v4360_v7  ;;  %v1042_v12 = vpop.f32.mrb[2].mxu0 }
 0x128   : > { %v1043_v13 = vadd.f32 %v1042_v12, %v4357_v6  ;;  %v1044_v14 = vpop.f32.mrb[3].mxu0  ;;  %v1117_v16 = vmax.f32 %v1039_v9, 0.0 }
 0x129   : > { %v1045_v15 = vadd.f32 %v1044_v14, %v4360_v7  ;;  %v1118_v18 = vmax.f32 %v1041_v11, 0.0 }
 0x12a   : > { %v1119_v17 = vmax.f32 %v1043_v13, 0.0 }
 0x12b   : > { %v1120_v19 = vmax.f32 %v1045_v15, 0.0 }
 0x12c   : > { %v1149_v20 = vpack.c.bf16 %v1119_v17, %v1117_v16 }
 0x12d   : > { %v1048_v21 = vpop.f32.mrb[4].mxu0  ;;  %v1150_v22 = vpack.c.bf16 %v1120_v19, %v1118_v18 }
 0x12e   : > { %v1049_v23 = vadd.f32 %v1048_v21, %v4357_v6  ;;  %v1050_v24 = vpop.f32.mrb[5].mxu0 }
 0x12f   : > { %v1051_v26 = vadd.f32 %v1050_v24, %v4360_v7  ;;  %v1052_v27 = vpop.f32.mrb[6].mxu0  ;;  %1332 = vmatprep.mubr.bf16.mxu1 %v1150_v22 }
 0x130   : > { %v1053_v28 = vadd.f32 %v1052_v27, %v4357_v6  ;;  %v1054_v29 = vpop.f32.mrb[7].mxu0  ;;  %1333 = vmatmul.mubr.bf16.vlgmr.msra.gmra.mrb[0].mxu1 %v1149_v20  ;;  %v1121_v31 = vmax.f32 %v1049_v23, 0.0 }
 0x131   : > { %v1055_v30 = vadd.f32 %v1054_v29, %v4360_v7  ;;  %3648 = vmatpush3.bf16.msra.mxu1 %v3873_v0  ;;  %v1122_v34 = vmax.f32 %v1051_v26, 0.0 }
 0x132   : > { %v1123_v32 = vmax.f32 %v1053_v28, 0.0  ;;  %3649 = vmatprep.subr.bf16.mxu1 %v3874_v25 }
 0x133   : > { %v1124_v35 = vmax.f32 %v1055_v30, 0.0 }
 0x134   : > { %v1151_v36 = vpack.c.bf16 %v1123_v32, %v1121_v31 }
 0x135   : > { %v1152_v37 = vpack.c.bf16 %v1124_v35, %v1122_v34  ;;  %v1058_v38 = vpop.f32.mrb[8].mxu0  ;;  %3650 = vmatpush3.bf16.msra.mxu1 %v3874_v25 }
 0x136   : > { %v1059_v39 = vadd.f32 %v1058_v38, %v4357_v6  ;;  %v1060_v40 = vpop.f32.mrb[9].mxu0  ;;  %3651 = vmatprep.subr.bf16.mxu1 %v3875_v33 }
 0x137   : > { %v1061_v42 = vadd.f32 %v1060_v40, %v4360_v7  ;;  %v1062_v43 = vpop.f32.mrb[10].mxu0  ;;  %1340 = vmatprep.mubr.bf16.mxu1 %v1152_v37 }
 0x138   : > { %v1063_v44 = vadd.f32 %v1062_v43, %v4357_v6  ;;  %v1064_v45 = vpop.f32.mrb[11].mxu0  ;;  %1341 = vmatmul.mubr.bf16.gmra.mrb[4].mxu1 %v1151_v36  ;;  %v1125_v47 = vmax.f32 %v1059_v39, 0.0 }
 0x139   : > { %v1065_v46 = vadd.f32 %v1064_v45, %v4360_v7  ;;  %3652 = vmatpush3.bf16.msra.mxu1 %v3875_v33  ;;  %v1126_v50 = vmax.f32 %v1061_v42, 0.0 }
 0x13a   : > { %v1127_v48 = vmax.f32 %v1063_v44, 0.0  ;;  %3653 = vmatprep.subr.bf16.mxu1 %v3876_v41 }
 0x13b   : > { %v1128_v51 = vmax.f32 %v1065_v46, 0.0 }
 0x13c   : > { %v1153_v52 = vpack.c.bf16 %v1127_v48, %v1125_v47 }
 0x13d   : > { %v1154_v53 = vpack.c.bf16 %v1128_v51, %v1126_v50  ;;  %v1068_v54 = vpop.f32.mrb[12].mxu0  ;;  %3654 = vmatpush3.bf16.msra.mxu1 %v3876_v41 }
 0x13e   : > { %v1069_v55 = vadd.f32 %v1068_v54, %v4357_v6  ;;  %v1070_v56 = vpop.f32.mrb[13].mxu0  ;;  %3655 = vmatprep.subr.bf16.mxu1 %v3877_v49 }
 0x13f   : > { %v1071_v58 = vadd.f32 %v1070_v56, %v4360_v7  ;;  %v1072_v59 = vpop.f32.mrb[14].mxu0  ;;  %1348 = vmatprep.mubr.bf16.mxu1 %v1154_v53 }
 0x140   : > { %v1073_v60 = vadd.f32 %v1072_v59, %v4357_v6  ;;  %v1074_v61 = vpop.f32.mrb[15].mxu0  ;;  %1349 = vmatmul.mubr.bf16.gmra.mrb[8].mxu1 %v1153_v52  ;;  %v1129_v63 = vmax.f32 %v1069_v55, 0.0 }
 0x141   : > { %v1075_v62 = vadd.f32 %v1074_v61, %v4360_v7  ;;  %3656 = vmatpush3.bf16.msra.mxu1 %v3877_v49  ;;  %v1130_v1 = vmax.f32 %v1071_v58, 0.0 }
 0x142   : > { %v1131_v0 = vmax.f32 %v1073_v60, 0.0  ;;  %3657 = vmatprep.subr.bf16.mxu1 %v3878_v57 }
 0x143   : > { %v1132_v2 = vmax.f32 %v1075_v62, 0.0 }
 0x144   : > { %v1155_v4 = vpack.c.bf16 %v1131_v0, %v1129_v63 }
 0x145   : > { %v1156_v8 = vpack.c.bf16 %v1132_v2, %v1130_v1  ;;  %v1078_v9 = vpop.f32.mrb[16].mxu0  ;;  %3658 = vmatpush3.bf16.msra.mxu1 %v3878_v57  ;;  %v3879_v1 = vld [vmem:[%s4977_s6 + $0x30] sm:$0xff]   ;;  %v3883_v2 = vld [vmem:[%s4979_s8 + $0x4] ss:$8 sps:$4 sm:$0xff]  }
 0x146   : > { %v1079_v10 = vadd.f32 %v1078_v9, %v4357_v6  ;;  %v1080_v11 = vpop.f32.mrb[17].mxu0  ;;  %3659 = vmatprep.subr.bf16.mxu1 %v3879_v1  ;;  %1698 = vmatprep.subr.bf16.mxu0 %v3883_v2  ;;  %v3889_v9 = vld [vmem:[%s4979_s8 + $0x24] ss:$8 sps:$4 sm:$0xff]  }
 0x147   : > { %v1081_v12 = vadd.f32 %v1080_v11, %v4360_v7  ;;  %v1082_v13 = vpop.f32.mrb[18].mxu0  ;;  %1356 = vmatprep.mubr.bf16.mxu1 %v1156_v8  ;;  %v3884_v8 = vld [vmem:[%s4979_s8 + $0x10] ss:$8 sps:$4 sm:$0xff]   ;;  %v3892_v11 = vld [vmem:[%s4979_s8 + $0x34] ss:$8 sps:$4 sm:$0xff]  }
 0x148   : > { %v1083_v14 = vadd.f32 %v1082_v13, %v4357_v6  ;;  %v1084_v15 = vpop.f32.mrb[19].mxu0  ;;  %1357 = vmatmul.mubr.bf16.gmra.mrb[12].mxu1 %v1155_v4  ;;  %v1133_v17 = vmax.f32 %v1079_v10, 0.0  ;;  %v3886_v4 = vld [vmem:[%s4979_s8 + $0x14] ss:$8 sps:$4 sm:$0xff]   ;;  %v3887_v10 = vld [vmem:[%s4979_s8 + $0x20] ss:$8 sps:$4 sm:$0xff]  }
 0x149   : > { %v1085_v16 = vadd.f32 %v1084_v15, %v4360_v7  ;;  %v1134_v19 = vmax.f32 %v1081_v12, 0.0  ;;  %3660 = vmatpush3.bf16.msra.mxu1 %v3879_v1  ;;  %v3890_v12 = vld [vmem:[%s4979_s8 + $0x30] ss:$8 sps:$4 sm:$0xff]  }
 0x14a   : > { %v1135_v18 = vmax.f32 %v1083_v14, 0.0  ;;  %v4442_v14 = vld [vmem:[%s5008_s28] ss:$0 sm:$0xff]  ;;  %s5009_s28 = sshll.u32 %s5013_s1, 3 }
 0x14b   : > { %v1136_v20 = vmax.f32 %v1085_v16, 0.0  ;;  %s4539_s30 = scalar_lea.vmem %s5010_s0, %s5009_s28 }
 0x14c   : > { %v1157_v21 = vpack.c.bf16 %v1135_v18, %v1133_v17 }
 0x14d   : > { %v1158_v22 = vpack.c.bf16 %v1136_v20, %v1134_v19  ;;  %v1088_v23 = vpop.f32.mrb[20].mxu0 }
 0x14e   : > { %v1089_v24 = vadd.f32 %v1088_v23, %v4357_v6  ;;  %v1090_v25 = vpop.f32.mrb[21].mxu0 }
 0x14f   : > { %v1091_v26 = vadd.f32 %v1090_v25, %v4360_v7  ;;  %v1092_v27 = vpop.f32.mrb[22].mxu0  ;;  %1364 = vmatprep.mubr.bf16.mxu1 %v1158_v22 }
 0x150   : > { %v1093_v28 = vadd.f32 %v1092_v27, %v4357_v6  ;;  %v1094_v29 = vpop.f32.mrb[23].mxu0  ;;  %1365 = vmatmul.mubr.bf16.gmra.mrb[16].mxu1 %v1157_v21  ;;  %v1137_v31 = vmax.f32 %v1089_v24, 0.0 }
 0x151   : > { %v1095_v30 = vadd.f32 %v1094_v29, %v4360_v7  ;;  %v1138_v33 = vmax.f32 %v1091_v26, 0.0 }
 0x152   : > { %v1139_v32 = vmax.f32 %v1093_v28, 0.0 }
 0x153   : > { %v1140_v34 = vmax.f32 %v1095_v30, 0.0 }
 0x154   : > { %v1159_v35 = vpack.c.bf16 %v1139_v32, %v1137_v31 }
 0x155   : > { %v1160_v36 = vpack.c.bf16 %v1140_v34, %v1138_v33  ;;  %v1098_v37 = vpop.f32.mrb[24].mxu0 }
 0x156   : > { %v1099_v38 = vadd.f32 %v1098_v37, %v4357_v6  ;;  %v1100_v39 = vpop.f32.mrb[25].mxu0 }
 0x157   : > { %v1101_v40 = vadd.f32 %v1100_v39, %v4360_v7  ;;  %v1102_v41 = vpop.f32.mrb[26].mxu0  ;;  %1372 = vmatprep.mubr.bf16.mxu1 %v1160_v36 }
 0x158   : > { %v1103_v42 = vadd.f32 %v1102_v41, %v4357_v6  ;;  %v1104_v43 = vpop.f32.mrb[27].mxu0  ;;  %1373 = vmatmul.mubr.bf16.gmra.mrb[20].mxu1 %v1159_v35  ;;  %v1141_v45 = vmax.f32 %v1099_v38, 0.0 }
 0x159   : > { %v1105_v44 = vadd.f32 %v1104_v43, %v4360_v7  ;;  %v1142_v47 = vmax.f32 %v1101_v40, 0.0 }
 0x15a   : > { %v1143_v46 = vmax.f32 %v1103_v42, 0.0 }
 0x15b   : > { %v1144_v48 = vmax.f32 %v1105_v44, 0.0 }
 0x15c   : > { %v1161_v49 = vpack.c.bf16 %v1143_v46, %v1141_v45 }
 0x15d   : > { %v1162_v50 = vpack.c.bf16 %v1144_v48, %v1142_v47  ;;  %v1108_v51 = vpop.f32.mrb[28].mxu0 }
 0x15e   : > { %v1109_v52 = vadd.f32 %v1108_v51, %v4357_v6  ;;  %v1110_v53 = vpop.f32.mrb[29].mxu0 }
 0x15f   : > { %v1111_v54 = vadd.f32 %v1110_v53, %v4360_v7  ;;  %v1112_v55 = vpop.f32.mrb[30].mxu0  ;;  %1380 = vmatprep.mubr.bf16.mxu1 %v1162_v50 }
 0x160   : > { %v1113_v56 = vadd.f32 %v1112_v55, %v4357_v6  ;;  %v1114_v57 = vpop.f32.mrb[31].mxu0  ;;  %1381 = vmatmul.mubr.bf16.gmra.mrb[24].mxu1 %v1161_v49  ;;  %v1145_v59 = vmax.f32 %v1109_v52, 0.0  ;;  %v3880_v6 = vld [vmem:[%s4977_s6 + $0x38] sm:$0xff]  }
 0x161   : > { %v1115_v58 = vadd.f32 %v1114_v57, %v4360_v7  ;;  %v1146_v61 = vmax.f32 %v1111_v54, 0.0  ;;  %3661 = vmatprep.subr.bf16.mxu1 %v3880_v6  ;;  %v3881_v7 = vld [vmem:[%s4979_s8] ss:$8 sps:$4 sm:$0xff]  }
 0x162   : > { %v1147_v60 = vmax.f32 %v1113_v56, 0.0  ;;  %3662 = vmatpush3.bf16.msra.mxu1 %v3880_v6  ;;  %1699 = vmatpush1.bf16.msra.mxu0 %v3881_v7 }
 0x163   : > { %v1148_v62 = vmax.f32 %v1115_v58, 0.0  ;;  %3767 = vmatprep.subr.bf16.mxu1 %v3883_v2  ;;  %1700 = vmatprep.subr.bf16.mxu0 %v3886_v4 }
 0x164   : > { %v1163_v63 = vpack.c.bf16 %v1147_v60, %v1145_v59 }
 0x165   : > { %v1164_v0 = vpack.c.bf16 %v1148_v62, %v1146_v61 }
 0x166   : > { %1701 = vmatpush1.bf16.msra.mxu0 %v3884_v8 }
 0x167   : > { %1388 = vmatprep.mubr.bf16.mxu1 %v1164_v0  ;;  %1702 = vmatprep.subr.bf16.mxu0 %v3889_v9 }
 0x168   : > { %1389 = vmatmul.mubr.bf16.gmra.mrb[28].mxu1 %v1163_v63 }
 0x16a   : > { %1703 = vmatpush1.bf16.msra.mxu0 %v3887_v10 }
 0x16b   : > { %1704 = vmatprep.subr.bf16.mxu0 %v3892_v11 }
 0x16e   : > { %1705 = vmatpush1.bf16.msra.mxu0 %v3890_v12 }
 0x203   : > { %v3539_v13 = vpop.f32.mrb[0].mxu1 }
 0x204   : > { %v3540_v15 = vpop.f32.mrb[1].mxu1 }
 0x205   : > { %v3541_v16 = vadd.f32 %v3540_v15, %v3539_v13  ;;  %v3542_v17 = vpop.f32.mrb[2].mxu1 }
 0x206   : > { %v3543_v18 = vpop.f32.mrb[3].mxu1 }
 0x207   : > { %v1335_v19 = vadd.f32 %v3541_v16, %v4442_v14  ;;  %v3544_v20 = vadd.f32 %v3543_v18, %v3542_v17 }
 0x209   : > { %v1338_v21 = vadd.f32 %v3544_v20, %v4442_v14  ;;  %v1397_v22 = vmax.f32 %v1335_v19, 0.0 }
 0x20b   : > { %v1398_v23 = vmax.f32 %v1338_v21, 0.0  ;;  %v3545_v24 = vpop.f32.mrb[4].mxu1 }
 0x20c   : > { %v3546_v25 = vpop.f32.mrb[5].mxu1 }
 0x20d   : > { %v3547_v26 = vadd.f32 %v3546_v25, %v3545_v24  ;;  %v3548_v27 = vpop.f32.mrb[6].mxu1  ;;  %v1413_v28 = vpack.c.bf16 %v1398_v23, %v1397_v22 }
 0x20e   : > { %v3549_v29 = vpop.f32.mrb[7].mxu1 }
 0x20f   : > { %v1343_v30 = vadd.f32 %v3547_v26, %v4442_v14  ;;  %v3550_v31 = vadd.f32 %v3549_v29, %v3548_v27  ;;  %3663 = vmatprep.mubr.bf16.mxu1 %v1413_v28 }
 0x211   : > { %v1346_v32 = vadd.f32 %v3550_v31, %v4442_v14  ;;  %v1399_v33 = vmax.f32 %v1343_v30, 0.0 }
 0x213   : > { %v1400_v34 = vmax.f32 %v1346_v32, 0.0  ;;  %v3551_v35 = vpop.f32.mrb[8].mxu1 }
 0x214   : > { %v3552_v36 = vpop.f32.mrb[9].mxu1 }
 0x215   : > { %v1414_v37 = vpack.c.bf16 %v1400_v34, %v1399_v33  ;;  %v3553_v38 = vadd.f32 %v3552_v36, %v3551_v35  ;;  %v3554_v39 = vpop.f32.mrb[10].mxu1 }
 0x216   : > { %v3555_v40 = vpop.f32.mrb[11].mxu1 }
 0x217   : > { %v1351_v41 = vadd.f32 %v3553_v38, %v4442_v14  ;;  %v3556_v42 = vadd.f32 %v3555_v40, %v3554_v39  ;;  %3664 = vmatmul.mubr.bf16.vlgmr.msra.gmra.mrb[32].mxu1 %v1414_v37 }
 0x218   : > { %3771 = vmatpush1.bf16.msra.mxu1 %v3881_v7 }
 0x219   : > { %v1354_v43 = vadd.f32 %v3556_v42, %v4442_v14  ;;  %3768 = vmatprep.subr.bf16.mxu1 %v3886_v4  ;;  %v1401_v44 = vmax.f32 %v1351_v41, 0.0  ;;  %v4057_v41 = vmov 0   ;;  %v3893_v42 = vld [vmem:[%s4981_s10] sm:$0xff]  }
 0x21a   : > { %1730 = vmatprep.mubr.bf16.mxu0 %v4057_v41 }
 0x21b   : > { %v1402_v45 = vmax.f32 %v1354_v43, 0.0  ;;  %v3557_v46 = vpop.f32.mrb[12].mxu1  ;;  %v4468_v43 = vld [vmem:[%s4978_s7] ss:$0 sm:$0xff] }
 0x21c   : > { %v3558_v47 = vpop.f32.mrb[13].mxu1  ;;  %3772 = vmatpush1.bf16.msra.mxu1 %v3884_v8 }
 0x21d   : > { %v3559_v48 = vadd.f32 %v3558_v47, %v3557_v46  ;;  %v3560_v49 = vpop.f32.mrb[14].mxu1  ;;  %v1415_v50 = vpack.c.bf16 %v1402_v45, %v1401_v44  ;;  %3769 = vmatprep.subr.bf16.mxu1 %v3889_v9 }
 0x21e   : > { %v3561_v51 = vpop.f32.mrb[15].mxu1 }
 0x21f   : > { %v1359_v52 = vadd.f32 %v3559_v48, %v4442_v14  ;;  %v3562_v53 = vadd.f32 %v3561_v51, %v3560_v49  ;;  %3667 = vmatprep.mubr.bf16.mxu1 %v1415_v50 }
 0x220   : > { %3773 = vmatpush1.bf16.msra.mxu1 %v3887_v10 }
 0x221   : > { %v1362_v54 = vadd.f32 %v3562_v53, %v4442_v14  ;;  %3770 = vmatprep.subr.bf16.mxu1 %v3892_v11  ;;  %v1403_v55 = vmax.f32 %v1359_v52, 0.0 }
 0x223   : > { %v1404_v56 = vmax.f32 %v1362_v54, 0.0  ;;  %v3563_v57 = vpop.f32.mrb[16].mxu1 }
 0x224   : > { %v3564_v58 = vpop.f32.mrb[17].mxu1  ;;  %3774 = vmatpush1.bf16.msra.mxu1 %v3890_v12 }
 0x225   : > { %v3565_v59 = vadd.f32 %v3564_v58, %v3563_v57  ;;  %v3566_v60 = vpop.f32.mrb[18].mxu1  ;;  %v1416_v61 = vpack.c.bf16 %v1404_v56, %v1403_v55  ;;  %3679 = vmatprep.subr.bf16.mxu1 %v3893_v42 }
 0x226   : > { %v3567_v62 = vpop.f32.mrb[19].mxu1 }
 0x227   : > { %v1367_v63 = vadd.f32 %v3565_v59, %v4442_v14  ;;  %v3568_v0 = vadd.f32 %v3567_v62, %v3566_v60  ;;  %3668 = vmatmul.mubr.bf16.gmra.mrb[36].mxu1 %v1416_v61 }
 0x229   : > { %v1370_v1 = vadd.f32 %v3568_v0, %v4442_v14  ;;  %v1405_v6 = vmax.f32 %v1367_v63, 0.0 }
 0x22b   : > { %v1406_v7 = vmax.f32 %v1370_v1, 0.0  ;;  %v3569_v2 = vpop.f32.mrb[20].mxu1 }
 0x22c   : > { %v3570_v4 = vpop.f32.mrb[21].mxu1 }
 0x22d   : > { %v3571_v8 = vadd.f32 %v3570_v4, %v3569_v2  ;;  %v3572_v9 = vpop.f32.mrb[22].mxu1  ;;  %v1417_v10 = vpack.c.bf16 %v1406_v7, %v1405_v6 }
 0x22e   : > { %v3573_v11 = vpop.f32.mrb[23].mxu1 }
 0x22f   : > { %v1375_v12 = vadd.f32 %v3571_v8, %v4442_v14  ;;  %v3574_v13 = vadd.f32 %v3573_v11, %v3572_v9  ;;  %3671 = vmatprep.mubr.bf16.mxu1 %v1417_v10 }
 0x231   : > { %v1378_v15 = vadd.f32 %v3574_v13, %v4442_v14  ;;  %v1407_v16 = vmax.f32 %v1375_v12, 0.0 }
 0x233   : > { %v1408_v17 = vmax.f32 %v1378_v15, 0.0  ;;  %v3575_v18 = vpop.f32.mrb[24].mxu1 }
 0x234   : > { %v3576_v19 = vpop.f32.mrb[25].mxu1 }
 0x235   : > { %v3577_v20 = vadd.f32 %v3576_v19, %v3575_v18  ;;  %v3578_v21 = vpop.f32.mrb[26].mxu1  ;;  %v1418_v22 = vpack.c.bf16 %v1408_v17, %v1407_v16 }
 0x236   : > { %v3579_v23 = vpop.f32.mrb[27].mxu1 }
 0x237   : > { %v1383_v24 = vadd.f32 %v3577_v20, %v4442_v14  ;;  %v3580_v25 = vadd.f32 %v3579_v23, %v3578_v21  ;;  %3672 = vmatmul.mubr.bf16.gmra.mrb[40].mxu1 %v1418_v22 }
 0x239   : > { %v1386_v26 = vadd.f32 %v3580_v25, %v4442_v14  ;;  %v1409_v27 = vmax.f32 %v1383_v24, 0.0  ;;  %v3894_v24 = vld [vmem:[%s4981_s10 + $0x8] sm:$0xff]   ;;  %v3895_v25 = vld [vmem:[%s4981_s10 + $0x10] sm:$0xff]  }
 0x23b   : > { %v1410_v28 = vmax.f32 %v1386_v26, 0.0  ;;  %v3581_v29 = vpop.f32.mrb[28].mxu1 }
 0x23c   : > { %v3582_v30 = vpop.f32.mrb[29].mxu1 }
 0x23d   : > { %v3583_v31 = vadd.f32 %v3582_v30, %v3581_v29  ;;  %v3584_v32 = vpop.f32.mrb[30].mxu1  ;;  %v1419_v33 = vpack.c.bf16 %v1410_v28, %v1409_v27  ;;  %v3896_v27 = vld [vmem:[%s4981_s10 + $0x18] sm:$0xff]  }
 0x23e   : > { %v3585_v34 = vpop.f32.mrb[31].mxu1 }
 0x23f   : > { %v1391_v35 = vadd.f32 %v3583_v31, %v4442_v14  ;;  %v3586_v36 = vadd.f32 %v3585_v34, %v3584_v32  ;;  %3675 = vmatprep.mubr.bf16.mxu1 %v1419_v33 }
 0x241   : > { %v1394_v37 = vadd.f32 %v3586_v36, %v4442_v14  ;;  %v1411_v38 = vmax.f32 %v1391_v35, 0.0 }
 0x243   : > { %v1412_v39 = vmax.f32 %v1394_v37, 0.0 }
 0x245   : > { %v1420_v40 = vpack.c.bf16 %v1412_v39, %v1411_v38 }
 0x247   : > { %3676 = vmatmul.mubr.bf16.gmra.mrb[44].mxu1 %v1420_v40 }
 0x248   : > { %1770 = vmatprep.mubr.bf16.mxu1 %v4057_v41 }
 0x2ea   : > { %v3665_v14 = vpop.f32.mrb[32].mxu1 }
 0x2eb   : > { %v1535_v44 = vadd.f32 %v3665_v14, %v4468_v43  ;;  %v1526_v45 = vpop.f32.mrb[33].mxu1  ;;  %v3899_v14 = vld [vmem:[%s4981_s10 + $0x30] sm:$0xff]  }
 0x2ec   : > { %v1527_v46 = vadd.f32 %v4468_v43, %v1526_v45  ;;  %v3666_v47 = vpop.f32.mrb[34].mxu1  ;;  %v4524_v45 = vld [vmem:[%s4983_s12] sm:$0xff]  }
 0x2ed   : > { %v1538_v48 = vadd.f32 %v3666_v47, %v4468_v43  ;;  %v1529_v49 = vpop.f32.mrb[35].mxu1  ;;  %v1591_v51 = vmax.f32 %v1535_v44, 0.0  ;;  %v3900_v44 = vld [vmem:[%s4981_s10 + $0x38] sm:$0xff]  }
 0x2ee   : > { %v1530_v50 = vadd.f32 %v4468_v43, %v1529_v49  ;;  %v1589_v53 = vmax.f32 %v1527_v46, 0.0  ;;  %v1621_v46 = vld [vmem:[%s4980_s9] sm:$0x3] }
 0x2ef   : > { %v1592_v52 = vmax.f32 %v1538_v48, 0.0  ;;  %v4532_v47 = vrot.slane %v1621_v46, %v4349_v3  ;;  %v4542_v48 = vrot.slane %v1621_v46, %v4354_v5 }
 0x2f0   : > { %v1590_v54 = vmax.f32 %v1530_v50, 0.0 }
 0x2f1   : > { %v1606_v55 = vpack.c.bf16 %v1592_v52, %v1591_v51  ;;  %v1811_v52 = vld [vmem:[%s4539_s30] sm:$0xff] }
 0x2f2   : > { %v1605_v56 = vpack.c.bf16 %v1590_v54, %v1589_v53 }
 0x2f4   : > { %3432 = vmatmul.mubr.msk.bf16.vlgmr.msra.gmra.mrb[32].mxu0 %vm1673_vm0, %v1605_v56 }
 0x2f5   : > { %1740 = vmatprep.mubr.bf16.mxu0 %v4057_v41 }
 0x2fa   : > { %v3669_v57 = vpop.f32.mrb[36].mxu1 }
 0x2fb   : > { %v1551_v58 = vadd.f32 %v3669_v57, %v4468_v43  ;;  %v1542_v59 = vpop.f32.mrb[37].mxu1  ;;  %v1812_v57 = vld [vmem:[%s4539_s30 + $0x8] sm:$0xff] }
 0x2fc   : > { %v1543_v60 = vadd.f32 %v4468_v43, %v1542_v59  ;;  %v3670_v61 = vpop.f32.mrb[38].mxu1  ;;  %3433 = vmatmul.mubr.msk.bf16.gmra.mrb[36].mxu0 %vm1673_vm0, %v1606_v55 }
 0x2fd   : > { %v1554_v62 = vadd.f32 %v3670_v61, %v4468_v43  ;;  %v1545_v63 = vpop.f32.mrb[39].mxu1  ;;  %1750 = vmatprep.mubr.bf16.mxu0 %v4057_v41  ;;  %v1595_v1 = vmax.f32 %v1551_v58, 0.0 }
 0x2fe   : > { %v1546_v0 = vadd.f32 %v4468_v43, %v1545_v63  ;;  %v1593_v7 = vmax.f32 %v1543_v60, 0.0 }
 0x2ff   : > { %v1596_v6 = vmax.f32 %v1554_v62, 0.0 }
 0x300   : > { %v1594_v2 = vmax.f32 %v1546_v0, 0.0 }
 0x301   : > { %v1608_v4 = vpack.c.bf16 %v1596_v6, %v1595_v1  ;;  %v1813_v6 = vld [vmem:[%s4539_s30 + $0x10] sm:$0xff] }
 0x302   : > { %v1607_v8 = vpack.c.bf16 %v1594_v2, %v1593_v7 }
 0x304   : > { %3434 = vmatmul.mubr.msk.bf16.gmra.mrb[40].mxu0 %vm1673_vm0, %v1607_v8 }
 0x305   : > { %1760 = vmatprep.mubr.bf16.mxu0 %v4057_v41 }
 0x30a   : > { %v3673_v9 = vpop.f32.mrb[40].mxu1 }
 0x30b   : > { %v1567_v10 = vadd.f32 %v3673_v9, %v4468_v43  ;;  %v1558_v11 = vpop.f32.mrb[41].mxu1 }
 0x30c   : > { %v1559_v12 = vadd.f32 %v4468_v43, %v1558_v11  ;;  %v3674_v13 = vpop.f32.mrb[42].mxu1  ;;  %3435 = vmatmul.mubr.msk.bf16.gmra.mrb[44].mxu0 %vm1673_vm0, %v1608_v4 }
 0x30d   : > { %v1570_v15 = vadd.f32 %v3674_v13, %v4468_v43  ;;  %v1561_v16 = vpop.f32.mrb[43].mxu1  ;;  %v1599_v18 = vmax.f32 %v1567_v10, 0.0  ;;  %v1814_v10 = vld [vmem:[%s4539_s30 + $0x18] sm:$0xff] }
 0x30e   : > { %v1562_v17 = vadd.f32 %v4468_v43, %v1561_v16  ;;  %v1597_v20 = vmax.f32 %v1559_v12, 0.0 }
 0x30f   : > { %v1600_v19 = vmax.f32 %v1570_v15, 0.0 }
 0x310   : > { %v1598_v21 = vmax.f32 %v1562_v17, 0.0 }
 0x311   : > { %v1610_v22 = vpack.c.bf16 %v1600_v19, %v1599_v18 }
 0x312   : > { %v1609_v23 = vpack.c.bf16 %v1598_v21, %v1597_v20  ;;  %v1815_v20 = vld [vmem:[%s4539_s30 + $0x20] sm:$0xff] }
 0x314   : > { %3436 = vmatmul.mubr.msk.bf16.vlgmr.msra.gmra.mrb[48].mxu1 %vm1673_vm0, %v1609_v23 }
 0x315   : > { %1780 = vmatprep.mubr.bf16.mxu1 %v4057_v41  ;;  %3680 = vmatpush3.bf16.msra.mxu1 %v3893_v42  ;;  %v3897_v42 = vld [vmem:[%s4981_s10 + $0x20] sm:$0xff]  }
 0x316   : > { %3681 = vmatprep.subr.bf16.mxu1 %v3894_v24 }
 0x319   : > { %3682 = vmatpush3.bf16.msra.mxu1 %v3894_v24  ;;  %v3902_v24 = vld [vmem:[%s4983_s12 + $0x8] sm:$0xff]  }
 0x31a   : > { %v3677_v26 = vpop.f32.mrb[44].mxu1  ;;  %3683 = vmatprep.subr.bf16.mxu1 %v3895_v25 }
 0x31b   : > { %v1583_v28 = vadd.f32 %v3677_v26, %v4468_v43  ;;  %v1574_v29 = vpop.f32.mrb[45].mxu1 }
 0x31c   : > { %v1575_v30 = vadd.f32 %v4468_v43, %v1574_v29  ;;  %v3678_v31 = vpop.f32.mrb[46].mxu1  ;;  %3437 = vmatmul.mubr.msk.bf16.gmra.mrb[52].mxu1 %vm1673_vm0, %v1610_v22 }
 0x31d   : > { %v1586_v32 = vadd.f32 %v3678_v31, %v4468_v43  ;;  %v1577_v33 = vpop.f32.mrb[47].mxu1  ;;  %1790 = vmatprep.mubr.bf16.mxu1 %v4057_v41  ;;  %3684 = vmatpush3.bf16.msra.mxu1 %v3895_v25  ;;  %v1603_v35 = vmax.f32 %v1583_v28, 0.0 }
 0x31e   : > { %v1578_v34 = vadd.f32 %v4468_v43, %v1577_v33  ;;  %3685 = vmatprep.subr.bf16.mxu1 %v3896_v27  ;;  %v1601_v37 = vmax.f32 %v1575_v30, 0.0  ;;  %v3898_v43 = vld [vmem:[%s4981_s10 + $0x28] sm:$0xff]  }
 0x31f   : > { %v1604_v36 = vmax.f32 %v1586_v32, 0.0  ;;  %v3903_v32 = vld [vmem:[%s4983_s12 + $0x10] sm:$0xff]  }
 0x320   : > { %v1602_v38 = vmax.f32 %v1578_v34, 0.0 }
 0x321   : > { %v1612_v39 = vpack.c.bf16 %v1604_v36, %v1603_v35  ;;  %3686 = vmatpush3.bf16.msra.mxu1 %v3896_v27  ;;  %v1816_v27 = vld [vmem:[%s4539_s30 + $0x28] sm:$0xff] }
 0x322   : > { %v1611_v40 = vpack.c.bf16 %v1602_v38, %v1601_v37  ;;  %3687 = vmatprep.subr.bf16.mxu1 %v3897_v42  ;;  %v1817_v37 = vld [vmem:[%s4539_s30 + $0x30] sm:$0xff] }
 0x324   : > { %3438 = vmatmul.mubr.msk.bf16.gmra.mrb[56].mxu1 %vm1673_vm0, %v1611_v40 }
 0x325   : > { %1800 = vmatprep.mubr.bf16.mxu1 %v4057_v41  ;;  %3688 = vmatpush3.bf16.msra.mxu1 %v3897_v42  ;;  %v3904_v42 = vld [vmem:[%s4983_s12 + $0x18] sm:$0xff]  }
 0x326   : > { %3689 = vmatprep.subr.bf16.mxu1 %v3898_v43 }
 0x329   : > { %3690 = vmatpush3.bf16.msra.mxu1 %v3898_v43 }
 0x32a   : > { %3691 = vmatprep.subr.bf16.mxu1 %v3899_v14 }
 0x32c   : > { %3439 = vmatmul.mubr.msk.bf16.gmra.mrb[60].mxu1 %vm1673_vm0, %v1612_v39 }
 0x32d   : > { %3692 = vmatpush3.bf16.msra.mxu1 %v3899_v14 }
 0x32e   : > { %3693 = vmatprep.subr.bf16.mxu1 %v3900_v44 }
 0x331   : > { %3694 = vmatpush3.bf16.msra.mxu1 %v3900_v44  ;;  %v1818_v44 = vld [vmem:[%s4539_s30 + $0x38] sm:$0xff] }
 0x332   : > { %3711 = vmatprep.subr.bf16.mxu1 %v4524_v45 }
 0x3c7   : > { %v1732_v49 = vpop.f32.mrb[32].mxu0 }
 0x3c8   : > { %v1733_v50 = vadd.f32 %v1732_v49, %v4532_v47  ;;  %v1734_v51 = vpop.f32.mrb[33].mxu0 }
 0x3c9   : > { %v1735_v53 = vadd.f32 %v1734_v51, %v4542_v48  ;;  %v1736_v54 = vpop.f32.mrb[34].mxu0  ;;  %v3905_v51 = vld [vmem:[%s4983_s12 + $0x20] sm:$0xff]  }
 0x3ca   : > { %3181 = vst [vmem:[%s4547_s22] sm:$0xff] %v1733_v50  ;;  %v1737_v55 = vadd.f32 %v1736_v54, %v4532_v47  ;;  %v1738_v56 = vpop.f32.mrb[35].mxu0 }
 0x3cb   : > { %v1827_v58 = vmul.f32 %v1811_v52, %v1735_v53  ;;  %3197 = vst [vmem:[%s4547_s22 + $0x8] sm:$0xff] %v1735_v53  ;;  %v1739_v59 = vadd.f32 %v1738_v56, %v4542_v48  ;;  %v1819_v56 = vld [vmem:[%s4539_s30 + $0x40] sm:$0xff] }
 0x3cc   : > { %3182 = vst [vmem:[%s4547_s22 + $0x18] sm:$0xff] %v1737_v55 }
 0x3cd   : > { %v1843_v60 = vadd.f32 %v1827_v58, %v1733_v50  ;;  %v1828_v61 = vmul.f32 %v1812_v57, %v1739_v59  ;;  %3198 = vst [vmem:[%s4547_s22 + $0x20] sm:$0xff] %v1739_v59 }
 0x3cf   : > { %3213 = vst [vmem:[%s4547_s22 + $0x10] sm:$0xff] %v1843_v60  ;;  %v1844_v62 = vadd.f32 %v1828_v61, %v1737_v55  ;;  %v1742_v63 = vpop.f32.mrb[36].mxu0 }
 0x3d0   : > { %v1743_v0 = vadd.f32 %v1742_v63, %v4532_v47  ;;  %v1744_v1 = vpop.f32.mrb[37].mxu0  ;;  %v1820_v63 = vld [vmem:[%s4539_s30 + $0x48] sm:$0xff] }
 0x3d1   : > { %3214 = vst [vmem:[%s4547_s22 + $0x28] sm:$0xff] %v1844_v62  ;;  %v1745_v7 = vadd.f32 %v1744_v1, %v4542_v48  ;;  %v1746_v2 = vpop.f32.mrb[38].mxu0  ;;  %v1859_v4 = vpack.c.bf16 %v1844_v62, %v1843_v60  ;;  %v3906_v60 = vld [vmem:[%s4983_s12 + $0x28] sm:$0xff]  }
 0x3d2   : > { %3183 = vst [vmem:[%s4547_s22 + $0x30] sm:$0xff] %v1743_v0  ;;  %v1747_v8 = vadd.f32 %v1746_v2, %v4532_v47  ;;  %v1748_v9 = vpop.f32.mrb[39].mxu0 }
 0x3d3   : > { %v1829_v11 = vmul.f32 %v1813_v6, %v1745_v7  ;;  %3199 = vst [vmem:[%s4547_s22 + $0x38] sm:$0xff] %v1745_v7  ;;  %v1749_v12 = vadd.f32 %v1748_v9, %v4542_v48  ;;  %3695 = vmatprep.mubr.bf16.mxu1 %v1859_v4 }
 0x3d4   : > { %3184 = vst [vmem:[%s4547_s22 + $0x48] sm:$0xff] %v1747_v8 }
 0x3d5   : > { %v1845_v13 = vadd.f32 %v1829_v11, %v1743_v0  ;;  %v1830_v15 = vmul.f32 %v1814_v10, %v1749_v12  ;;  %3200 = vst [vmem:[%s4547_s22 + $0x50] sm:$0xff] %v1749_v12  ;;  %v1821_v10 = vld [vmem:[%s4539_s30 + $0x50] sm:$0xff] }
 0x3d7   : > { %3215 = vst [vmem:[%s4547_s22 + $0x40] sm:$0xff] %v1845_v13  ;;  %v1846_v16 = vadd.f32 %v1830_v15, %v1747_v8  ;;  %v1752_v17 = vpop.f32.mrb[40].mxu0 }
 0x3d8   : > { %v1753_v18 = vadd.f32 %v1752_v17, %v4532_v47  ;;  %v1754_v19 = vpop.f32.mrb[41].mxu0  ;;  %v1822_v17 = vld [vmem:[%s4539_s30 + $0x58] sm:$0xff] }
 0x3d9   : > { %v1860_v21 = vpack.c.bf16 %v1846_v16, %v1845_v13  ;;  %3216 = vst [vmem:[%s4547_s22 + $0x58] sm:$0xff] %v1846_v16  ;;  %v1755_v22 = vadd.f32 %v1754_v19, %v4542_v48  ;;  %v1756_v23 = vpop.f32.mrb[42].mxu0 }
 0x3da   : > { %3185 = vst [vmem:[%s4547_s22 + $0x60] sm:$0xff] %v1753_v18  ;;  %v1757_v25 = vadd.f32 %v1756_v23, %v4532_v47  ;;  %v1758_v26 = vpop.f32.mrb[43].mxu0 }
 0x3db   : > { %v1831_v28 = vmul.f32 %v1815_v20, %v1755_v22  ;;  %3201 = vst [vmem:[%s4547_s22 + $0x68] sm:$0xff] %v1755_v22  ;;  %v1759_v29 = vadd.f32 %v1758_v26, %v4542_v48  ;;  %3696 = vmatmul.mubr.bf16.vlgmr.msra.gmra.mrb[64].mxu1 %v1860_v21  ;;  %v1823_v26 = vld [vmem:[%s4539_s30 + $0x60] sm:$0xff] }
 0x3dc   : > { %3186 = vst [vmem:[%s4547_s22 + $0x78] sm:$0xff] %v1757_v25  ;;  %3712 = vmatpush3.bf16.msra.mxu1 %v4524_v45 }
 0x3dd   : > { %v1847_v30 = vadd.f32 %v1831_v28, %v1753_v18  ;;  %v1832_v31 = vmul.f32 %v1816_v27, %v1759_v29  ;;  %3202 = vst [vmem:[%s4547_s22 + $0x80] sm:$0xff] %v1759_v29  ;;  %3713 = vmatprep.subr.bf16.mxu1 %v3902_v24 }
 0x3df   : > { %3217 = vst [vmem:[%s4547_s22 + $0x70] sm:$0xff] %v1847_v30  ;;  %v1848_v33 = vadd.f32 %v1832_v31, %v1757_v25  ;;  %v1762_v34 = vpop.f32.mrb[44].mxu0 }
 0x3e0   : > { %v1763_v35 = vadd.f32 %v1762_v34, %v4532_v47  ;;  %v1764_v36 = vpop.f32.mrb[45].mxu0  ;;  %3714 = vmatpush3.bf16.msra.mxu1 %v3902_v24 }
 0x3e1   : > { %3218 = vst [vmem:[%s4547_s22 + $0x88] sm:$0xff] %v1848_v33  ;;  %v1765_v38 = vadd.f32 %v1764_v36, %v4542_v48  ;;  %v1766_v39 = vpop.f32.mrb[46].mxu0  ;;  %v1861_v40 = vpack.c.bf16 %v1848_v33, %v1847_v30  ;;  %3715 = vmatprep.subr.bf16.mxu1 %v3903_v32 }
 0x3e2   : > { %3187 = vst [vmem:[%s4547_s22 + $0x90] sm:$0xff] %v1763_v35  ;;  %v1767_v43 = vadd.f32 %v1766_v39, %v4532_v47  ;;  %v1768_v14 = vpop.f32.mrb[47].mxu0 }
 0x3e3   : > { %v1833_v45 = vmul.f32 %v1817_v37, %v1765_v38  ;;  %3203 = vst [vmem:[%s4547_s22 + $0x98] sm:$0xff] %v1765_v38  ;;  %v1769_v46 = vadd.f32 %v1768_v14, %v4542_v48  ;;  %3699 = vmatprep.mubr.bf16.mxu1 %v1861_v40 }
 0x3e4   : > { %3188 = vst [vmem:[%s4547_s22 + $0xa8] sm:$0xff] %v1767_v43  ;;  %3716 = vmatpush3.bf16.msra.mxu1 %v3903_v32  ;;  %v1824_v32 = vld [vmem:[%s4539_s30 + $0x68] sm:$0xff] }
 0x3e5   : > { %v1849_v49 = vadd.f32 %v1833_v45, %v1763_v35  ;;  %v1834_v50 = vmul.f32 %v1818_v44, %v1769_v46  ;;  %3204 = vst [vmem:[%s4547_s22 + $0xb0] sm:$0xff] %v1769_v46  ;;  %3717 = vmatprep.subr.bf16.mxu1 %v3904_v42 }
 0x3e7   : > { %3219 = vst [vmem:[%s4547_s22 + $0xa0] sm:$0xff] %v1849_v49  ;;  %v1850_v52 = vadd.f32 %v1834_v50, %v1767_v43  ;;  %v1772_v53 = vpop.f32.mrb[48].mxu1 }
 0x3e8   : > { %v1773_v54 = vadd.f32 %v1772_v53, %v4532_v47  ;;  %v1774_v55 = vpop.f32.mrb[49].mxu1  ;;  %3718 = vmatpush3.bf16.msra.mxu1 %v3904_v42  ;;  %v1825_v42 = vld [vmem:[%s4539_s30 + $0x70] sm:$0xff] }
 0x3e9   : > { %3220 = vst [vmem:[%s4547_s22 + $0xb8] sm:$0xff] %v1850_v52  ;;  %v1775_v57 = vadd.f32 %v1774_v55, %v4542_v48  ;;  %v1776_v58 = vpop.f32.mrb[50].mxu1  ;;  %v1862_v59 = vpack.c.bf16 %v1850_v52, %v1849_v49  ;;  %3719 = vmatprep.subr.bf16.mxu1 %v3905_v51  ;;  %v1826_v49 = vld [vmem:[%s4539_s30 + $0x78] sm:$0xff] }
 0x3ea   : > { %3189 = vst [vmem:[%s4547_s22 + $0xc0] sm:$0xff] %v1773_v54  ;;  %v1777_v61 = vadd.f32 %v1776_v58, %v4532_v47  ;;  %v1778_v62 = vpop.f32.mrb[51].mxu1  ;;  %v3911_v58 = vld [vmem:[%s4985_s14 + $0x10] sm:$0xff]  }
 0x3eb   : > { %v1835_v0 = vmul.f32 %v1819_v56, %v1775_v57  ;;  %3205 = vst [vmem:[%s4547_s22 + $0xc8] sm:$0xff] %v1775_v57  ;;  %v1779_v1 = vadd.f32 %v1778_v62, %v4542_v48  ;;  %3700 = vmatmul.mubr.bf16.gmra.mrb[68].mxu1 %v1862_v59  ;;  %v3909_v56 = vld [vmem:[%s4985_s14] sm:$0xff]   ;;  %v3910_v57 = vld [vmem:[%s4985_s14 + $0x8] sm:$0xff]  }
 0x3ec   : > { %3190 = vst [vmem:[%s4547_s22 + $0xd8] sm:$0xff] %v1777_v61  ;;  %3720 = vmatpush3.bf16.msra.mxu1 %v3905_v51  ;;  %3743 = vmatprep.subr.bf16.mxu0 %v3909_v56  ;;  %v3440_v59 = vld [vmem:[%s4982_s11] ss:$0 sm:$0xff] }
 0x3ed   : > { %v1851_v6 = vadd.f32 %v1835_v0, %v1773_v54  ;;  %v1836_v7 = vmul.f32 %v1820_v63, %v1779_v1  ;;  %3206 = vst [vmem:[%s4547_s22 + $0xe0] sm:$0xff] %v1779_v1  ;;  %3721 = vmatprep.subr.bf16.mxu1 %v3906_v60  ;;  %3744 = vmatpush3.bf16.msra.mxu0 %v3909_v56  ;;  %v3913_v56 = vld [vmem:[%s4987_s16] ss:$8 sps:$4 sm:$0xff]  }
 0x3ee   : > { %3745 = vmatprep.subr.bf16.mxu0 %v3910_v57 }
 0x3ef   : > { %3221 = vst [vmem:[%s4547_s22 + $0xd0] sm:$0xff] %v1851_v6  ;;  %v1852_v2 = vadd.f32 %v1836_v7, %v1777_v61  ;;  %v1782_v4 = vpop.f32.mrb[52].mxu1 }
 0x3f0   : > { %v1783_v8 = vadd.f32 %v1782_v4, %v4532_v47  ;;  %v1784_v9 = vpop.f32.mrb[53].mxu1  ;;  %3722 = vmatpush3.bf16.msra.mxu1 %v3906_v60 }
 0x3f1   : > { %3222 = vst [vmem:[%s4547_s22 + $0xe8] sm:$0xff] %v1852_v2  ;;  %v1785_v11 = vadd.f32 %v1784_v9, %v4542_v48  ;;  %v1786_v12 = vpop.f32.mrb[54].mxu1  ;;  %v1863_v13 = vpack.c.bf16 %v1852_v2, %v1851_v6  ;;  %3746 = vmatpush3.bf16.msra.mxu0 %v3910_v57  ;;  %v3915_v57 = vld [vmem:[%s4987_s16 + $0x4] ss:$8 sps:$4 sm:$0xff]  }
 0x3f2   : > { %3191 = vst [vmem:[%s4547_s22 + $0xf0] sm:$0xff] %v1783_v8  ;;  %v1787_v15 = vadd.f32 %v1786_v12, %v4532_v47  ;;  %v1788_v16 = vpop.f32.mrb[55].mxu1  ;;  %3747 = vmatprep.subr.bf16.mxu0 %v3911_v58 }
 0x3f3   : > { %v1837_v18 = vmul.f32 %v1821_v10, %v1785_v11  ;;  %3207 = vst [vmem:[%s4547_s22 + $0xf8] sm:$0xff] %v1785_v11  ;;  %v1789_v19 = vadd.f32 %v1788_v16, %v4542_v48  ;;  %3703 = vmatprep.mubr.bf16.mxu1 %v1863_v13 }
 0x3f4   : > { %3192 = vst [vmem:[%s4547_s22 + $0x108] sm:$0xff] %v1787_v15 }
 0x3f5   : > { %v1853_v20 = vadd.f32 %v1837_v18, %v1783_v8  ;;  %v1838_v21 = vmul.f32 %v1822_v17, %v1789_v19  ;;  %3208 = vst [vmem:[%s4547_s22 + $0x110] sm:$0xff] %v1789_v19  ;;  %3748 = vmatpush3.bf16.msra.mxu0 %v3911_v58  ;;  %v3918_v58 = vld [vmem:[%s4987_s16 + $0x14] ss:$8 sps:$4 sm:$0xff]  }
 0x3f7   : > { %3223 = vst [vmem:[%s4547_s22 + $0x100] sm:$0xff] %v1853_v20  ;;  %v1854_v22 = vadd.f32 %v1838_v21, %v1787_v15  ;;  %v1792_v23 = vpop.f32.mrb[56].mxu1 }
 0x3f8   : > { %v1793_v24 = vadd.f32 %v1792_v23, %v4532_v47  ;;  %v1794_v25 = vpop.f32.mrb[57].mxu1 }
 0x3f9   : > { %3224 = vst [vmem:[%s4547_s22 + $0x118] sm:$0xff] %v1854_v22  ;;  %v1795_v27 = vadd.f32 %v1794_v25, %v4542_v48  ;;  %v1796_v28 = vpop.f32.mrb[58].mxu1  ;;  %v1864_v29 = vpack.c.bf16 %v1854_v22, %v1853_v20 }
 0x3fa   : > { %3193 = vst [vmem:[%s4547_s22 + $0x120] sm:$0xff] %v1793_v24  ;;  %v1797_v30 = vadd.f32 %v1796_v28, %v4532_v47  ;;  %v1798_v31 = vpop.f32.mrb[59].mxu1 }
 0x3fb   : > { %v1839_v33 = vmul.f32 %v1823_v26, %v1795_v27  ;;  %3209 = vst [vmem:[%s4547_s22 + $0x128] sm:$0xff] %v1795_v27  ;;  %v1799_v34 = vadd.f32 %v1798_v31, %v4542_v48  ;;  %3704 = vmatmul.mubr.bf16.gmra.mrb[72].mxu1 %v1864_v29 }
 0x3fc   : > { %3194 = vst [vmem:[%s4547_s22 + $0x138] sm:$0xff] %v1797_v30 }
 0x3fd   : > { %v1855_v35 = vadd.f32 %v1839_v33, %v1793_v24  ;;  %v1840_v36 = vmul.f32 %v1824_v32, %v1799_v34  ;;  %3210 = vst [vmem:[%s4547_s22 + $0x140] sm:$0xff] %v1799_v34 }
 0x3ff   : > { %3225 = vst [vmem:[%s4547_s22 + $0x130] sm:$0xff] %v1855_v35  ;;  %v1856_v37 = vadd.f32 %v1840_v36, %v1797_v30  ;;  %v1802_v38 = vpop.f32.mrb[60].mxu1 }
 0x400   : > { %v1803_v39 = vadd.f32 %v1802_v38, %v4532_v47  ;;  %v1804_v40 = vpop.f32.mrb[61].mxu1 }
 0x401   : > { %3226 = vst [vmem:[%s4547_s22 + $0x148] sm:$0xff] %v1856_v37  ;;  %v1805_v43 = vadd.f32 %v1804_v40, %v4542_v48  ;;  %v1806_v14 = vpop.f32.mrb[62].mxu1  ;;  %v1865_v44 = vpack.c.bf16 %v1856_v37, %v1855_v35 }
 0x402   : > { %3195 = vst [vmem:[%s4547_s22 + $0x150] sm:$0xff] %v1803_v39  ;;  %v1807_v45 = vadd.f32 %v1806_v14, %v4532_v47  ;;  %v1808_v46 = vpop.f32.mrb[63].mxu1  ;;  %v3907_v47 = vld [vmem:[%s4983_s12 + $0x30] sm:$0xff]  }
 0x403   : > { %v1841_v50 = vmul.f32 %v1825_v42, %v1805_v43  ;;  %3211 = vst [vmem:[%s4547_s22 + $0x158] sm:$0xff] %v1805_v43  ;;  %v1809_v51 = vadd.f32 %v1808_v46, %v4542_v48  ;;  %3707 = vmatprep.mubr.bf16.mxu1 %v1865_v44  ;;  %3723 = vmatprep.subr.bf16.mxu1 %v3907_v47  ;;  %v3908_v48 = vld [vmem:[%s4983_s12 + $0x38] sm:$0xff]  }
 0x404   : > { %3196 = vst [vmem:[%s4547_s22 + $0x168] sm:$0xff] %v1807_v45  ;;  %3724 = vmatpush3.bf16.msra.mxu1 %v3907_v47 }
 0x405   : > { %v1857_v52 = vadd.f32 %v1841_v50, %v1803_v39  ;;  %v1842_v53 = vmul.f32 %v1826_v49, %v1809_v51  ;;  %3212 = vst [vmem:[%s4547_s22 + $0x170] sm:$0xff] %v1809_v51  ;;  %3725 = vmatprep.subr.bf16.mxu1 %v3908_v48 }
 0x407   : > { %3227 = vst [vmem:[%s4547_s22 + $0x160] sm:$0xff] %v1857_v52  ;;  %v1858_v54 = vadd.f32 %v1842_v53, %v1807_v45 }
 0x408   : > { %3726 = vmatpush3.bf16.msra.mxu1 %v3908_v48  ;;  %v3912_v48 = vld [vmem:[%s4985_s14 + $0x18] sm:$0xff]  }
 0x409   : > { %3228 = vst [vmem:[%s4547_s22 + $0x178] sm:$0xff] %v1858_v54  ;;  %v1866_v55 = vpack.c.bf16 %v1858_v54, %v1857_v52  ;;  %3749 = vmatprep.subr.bf16.mxu0 %v3912_v48  ;;  %2543 = vmatprep.subr.bf16.mxu1 %v3915_v57 }
 0x40a   : > { %3750 = vmatpush3.bf16.msra.mxu0 %v3912_v48 }
 0x40b   : > { %3708 = vmatmul.mubr.bf16.gmra.mrb[76].mxu1 %v1866_v55 }
 0x4ae   : > { %v3697_v60 = vpop.f32.mrb[64].mxu1 }
 0x4af   : > { %v1981_v61 = vadd.f32 %v3697_v60, %v3440_v59  ;;  %v1972_v62 = vpop.f32.mrb[65].mxu1  ;;  %v3921_v60 = vld [vmem:[%s4987_s16 + $0x24] ss:$8 sps:$4 sm:$0xff]  }
 0x4b0   : > { %v1973_v63 = vadd.f32 %v3440_v59, %v1972_v62  ;;  %v3698_v0 = vpop.f32.mrb[66].mxu1  ;;  %v3924_v62 = vld [vmem:[%s4987_s16 + $0x34] ss:$8 sps:$4 sm:$0xff]  }
 0x4b1   : > { %v1984_v1 = vadd.f32 %v3698_v0, %v3440_v59  ;;  %v1975_v6 = vpop.f32.mrb[67].mxu1  ;;  %v2037_v2 = vmax.f32 %v1981_v61, 0.0  ;;  %v3919_v61 = vld [vmem:[%s4987_s16 + $0x20] ss:$8 sps:$4 sm:$0xff]   ;;  %v3927_v0 = vld [vmem:[%s4987_s16 + $0x44] ss:$8 sps:$4 sm:$0xff]  }
 0x4b2   : > { %v1976_v7 = vadd.f32 %v3440_v59, %v1975_v6  ;;  %v2035_v8 = vmax.f32 %v1973_v63, 0.0  ;;  %v3922_v63 = vld [vmem:[%s4987_s16 + $0x30] ss:$8 sps:$4 sm:$0xff]   ;;  %v3930_v6 = vld [vmem:[%s4987_s16 + $0x54] ss:$8 sps:$4 sm:$0xff]  }
 0x4b3   : > { %v2038_v4 = vmax.f32 %v1984_v1, 0.0  ;;  %v3925_v1 = vld [vmem:[%s4987_s16 + $0x40] ss:$8 sps:$4 sm:$0xff]  }
 0x4b4   : > { %v2036_v9 = vmax.f32 %v1976_v7, 0.0  ;;  %v3928_v7 = vld [vmem:[%s4987_s16 + $0x50] ss:$8 sps:$4 sm:$0xff]  }
 0x4b5   : > { %v2052_v10 = vpack.c.bf16 %v2038_v4, %v2037_v2  ;;  %v3449_v2 = vld [vmem:[%s4984_s13] ss:$0 sm:$0xff] }
 0x4b6   : > { %v2051_v11 = vpack.c.bf16 %v2036_v9, %v2035_v8 }
 0x4b8   : > { %3727 = vmatprep.mubr.bf16.mxu1 %v2051_v11 }
 0x4b9   : > { %3728 = vmatmul.mubr.bf16.vlgmr.msra.gmra.mrb[80].mxu1 %v2052_v10 }
 0x4ba   : > { %2544 = vmatpush1.bf16.msra.mxu1 %v3913_v56 }
 0x4bb   : > { %2545 = vmatprep.subr.bf16.mxu1 %v3918_v58 }
 0x4be   : > { %v3701_v12 = vpop.f32.mrb[68].mxu1 }
 0x4bf   : > { %v1997_v13 = vadd.f32 %v3701_v12, %v3440_v59  ;;  %v1988_v15 = vpop.f32.mrb[69].mxu1 }
 0x4c0   : > { %v1989_v16 = vadd.f32 %v3440_v59, %v1988_v15  ;;  %v3702_v17 = vpop.f32.mrb[70].mxu1 }
 0x4c1   : > { %v2000_v18 = vadd.f32 %v3702_v17, %v3440_v59  ;;  %v1991_v19 = vpop.f32.mrb[71].mxu1  ;;  %v2041_v21 = vmax.f32 %v1997_v13, 0.0 }
 0x4c2   : > { %v1992_v20 = vadd.f32 %v3440_v59, %v1991_v19  ;;  %v2039_v23 = vmax.f32 %v1989_v16, 0.0 }
 0x4c3   : > { %v2042_v22 = vmax.f32 %v2000_v18, 0.0 }
 0x4c4   : > { %v2040_v24 = vmax.f32 %v1992_v20, 0.0 }
 0x4c5   : > { %v2054_v25 = vpack.c.bf16 %v2042_v22, %v2041_v21 }
 0x4c6   : > { %v2053_v26 = vpack.c.bf16 %v2040_v24, %v2039_v23 }
 0x4c8   : > { %3731 = vmatprep.mubr.bf16.mxu1 %v2053_v26 }
 0x4c9   : > { %3732 = vmatmul.mubr.bf16.gmra.mrb[84].mxu1 %v2054_v25 }
 0x4ce   : > { %v3705_v27 = vpop.f32.mrb[72].mxu1 }
 0x4cf   : > { %v2013_v28 = vadd.f32 %v3705_v27, %v3440_v59  ;;  %v2004_v29 = vpop.f32.mrb[73].mxu1 }
 0x4d0   : > { %v2005_v30 = vadd.f32 %v3440_v59, %v2004_v29  ;;  %v3706_v31 = vpop.f32.mrb[74].mxu1 }
 0x4d1   : > { %v2016_v32 = vadd.f32 %v3706_v31, %v3440_v59  ;;  %v2007_v33 = vpop.f32.mrb[75].mxu1  ;;  %v2045_v35 = vmax.f32 %v2013_v28, 0.0 }
 0x4d2   : > { %v2008_v34 = vadd.f32 %v3440_v59, %v2007_v33  ;;  %v2043_v37 = vmax.f32 %v2005_v30, 0.0 }
 0x4d3   : > { %v2046_v36 = vmax.f32 %v2016_v32, 0.0 }
 0x4d4   : > { %v2044_v38 = vmax.f32 %v2008_v34, 0.0 }
 0x4d5   : > { %v2056_v39 = vpack.c.bf16 %v2046_v36, %v2045_v35 }
 0x4d6   : > { %v2055_v40 = vpack.c.bf16 %v2044_v38, %v2043_v37 }
 0x4d8   : > { %3735 = vmatprep.mubr.bf16.mxu1 %v2055_v40 }
 0x4d9   : > { %3736 = vmatmul.mubr.bf16.gmra.mrb[88].mxu1 %v2056_v39 }
 0x4de   : > { %v3709_v42 = vpop.f32.mrb[76].mxu1 }
 0x4df   : > { %v2029_v43 = vadd.f32 %v3709_v42, %v3440_v59  ;;  %v2020_v14 = vpop.f32.mrb[77].mxu1 }
 0x4e0   : > { %v2021_v44 = vadd.f32 %v3440_v59, %v2020_v14  ;;  %v3710_v45 = vpop.f32.mrb[78].mxu1 }
 0x4e1   : > { %v2032_v46 = vadd.f32 %v3710_v45, %v3440_v59  ;;  %v2023_v49 = vpop.f32.mrb[79].mxu1  ;;  %v2049_v51 = vmax.f32 %v2029_v43, 0.0 }
 0x4e2   : > { %v2024_v50 = vadd.f32 %v3440_v59, %v2023_v49  ;;  %v2047_v53 = vmax.f32 %v2021_v44, 0.0  ;;  %v3916_v59 = vld [vmem:[%s4987_s16 + $0x10] ss:$8 sps:$4 sm:$0xff]  }
 0x4e3   : > { %v2050_v52 = vmax.f32 %v2032_v46, 0.0  ;;  %2546 = vmatpush1.bf16.msra.mxu1 %v3916_v59 }
 0x4e4   : > { %v2048_v54 = vmax.f32 %v2024_v50, 0.0  ;;  %2547 = vmatprep.subr.bf16.mxu1 %v3921_v60 }
 0x4e5   : > { %v2058_v55 = vpack.c.bf16 %v2050_v52, %v2049_v51 }
 0x4e6   : > { %v2057_v47 = vpack.c.bf16 %v2048_v54, %v2047_v53 }
 0x4e7   : > { %2548 = vmatpush1.bf16.msra.mxu1 %v3919_v61 }
 0x4e8   : > { %3739 = vmatprep.mubr.bf16.mxu1 %v2057_v47  ;;  %2549 = vmatprep.subr.bf16.mxu1 %v3924_v62 }
 0x4e9   : > { %3740 = vmatmul.mubr.bf16.gmra.mrb[92].mxu1 %v2058_v55 }
 0x4ea   : > { %2575 = vmatprep.mubr.bf16.mxu1 %v4057_v41 }
 0x4eb   : > { %2550 = vmatpush1.bf16.msra.mxu1 %v3922_v63 }
 0x4ec   : > { %2551 = vmatprep.subr.bf16.mxu1 %v3927_v0  ;;  %v3933_v0 = vld [vmem:[%s4987_s16 + $0x64] ss:$8 sps:$4 sm:$0xff]  }
 0x4ef   : > { %2552 = vmatpush1.bf16.msra.mxu1 %v3925_v1  ;;  %v3931_v1 = vld [vmem:[%s4987_s16 + $0x60] ss:$8 sps:$4 sm:$0xff]  }
 0x4f0   : > { %2553 = vmatprep.subr.bf16.mxu1 %v3930_v6  ;;  %v3936_v6 = vld [vmem:[%s4987_s16 + $0x74] ss:$8 sps:$4 sm:$0xff]  }
 0x4f3   : > { %2554 = vmatpush1.bf16.msra.mxu1 %v3928_v7  ;;  %v3934_v7 = vld [vmem:[%s4987_s16 + $0x70] ss:$8 sps:$4 sm:$0xff]  }
 0x4f4   : > { %2555 = vmatprep.subr.bf16.mxu1 %v3933_v0 }
 0x4f7   : > { %2556 = vmatpush1.bf16.msra.mxu1 %v3931_v1 }
 0x4f8   : > { %2557 = vmatprep.subr.bf16.mxu1 %v3936_v6 }
 0x4fb   : > { %2558 = vmatpush1.bf16.msra.mxu1 %v3934_v7 }
 0x58c   : > { %v3729_v4 = vpop.f32.mrb[80].mxu1 }
 0x58d   : > { %v2173_v8 = vadd.f32 %v3729_v4, %v3449_v2  ;;  %v2164_v9 = vpop.f32.mrb[81].mxu1  ;;  %v3939_v4 = vld [vmem:[%s4989_s18 + $0x4] ss:$8 sps:$4 sm:$0xff]  }
 0x58e   : > { %v2165_v10 = vadd.f32 %v3449_v2, %v2164_v9  ;;  %v3730_v11 = vpop.f32.mrb[82].mxu1  ;;  %2908 = vmatprep.subr.bf16.mxu0 %v3939_v4  ;;  %v3940_v9 = vld [vmem:[%s4989_s18 + $0x10] ss:$8 sps:$4 sm:$0xff]  }
 0x58f   : > { %v2176_v12 = vadd.f32 %v3730_v11, %v3449_v2  ;;  %v2167_v13 = vpop.f32.mrb[83].mxu1  ;;  %v2229_v16 = vmax.f32 %v2173_v8, 0.0  ;;  %v3942_v8 = vld [vmem:[%s4989_s18 + $0x14] ss:$8 sps:$4 sm:$0xff]   ;;  %v3943_v11 = vld [vmem:[%s4989_s18 + $0x20] ss:$8 sps:$4 sm:$0xff]  }
 0x590   : > { %v2168_v15 = vadd.f32 %v3449_v2, %v2167_v13  ;;  %v2227_v18 = vmax.f32 %v2165_v10, 0.0  ;;  %v3945_v10 = vld [vmem:[%s4989_s18 + $0x24] ss:$8 sps:$4 sm:$0xff]   ;;  %v3946_v13 = vld [vmem:[%s4989_s18 + $0x30] ss:$8 sps:$4 sm:$0xff]  }
 0x591   : > { %v2230_v17 = vmax.f32 %v2176_v12, 0.0  ;;  %v3948_v12 = vld [vmem:[%s4989_s18 + $0x34] ss:$8 sps:$4 sm:$0xff]  }
 0x592   : > { %v2228_v19 = vmax.f32 %v2168_v15, 0.0  ;;  %v3951_v15 = vld [vmem:[%s4989_s18 + $0x44] ss:$8 sps:$4 sm:$0xff]  }
 0x593   : > { %v2244_v20 = vpack.c.bf16 %v2230_v17, %v2229_v16  ;;  %v3949_v16 = vld [vmem:[%s4989_s18 + $0x40] ss:$8 sps:$4 sm:$0xff]   ;;  %v3954_v17 = vld [vmem:[%s4989_s18 + $0x54] ss:$8 sps:$4 sm:$0xff]  }
 0x594   : > { %v2243_v21 = vpack.c.bf16 %v2228_v19, %v2227_v18  ;;  %v3952_v18 = vld [vmem:[%s4989_s18 + $0x50] ss:$8 sps:$4 sm:$0xff]   ;;  %v3957_v19 = vld [vmem:[%s4989_s18 + $0x64] ss:$8 sps:$4 sm:$0xff]  }
 0x596   : > { %3751 = vmatprep.mubr.msk.bf16.mxu0 %vm1673_vm0, %v2243_v21  ;;  %v3960_v21 = vld [vmem:[%s4989_s18 + $0x74] ss:$8 sps:$4 sm:$0xff]  }
 0x597   : > { %3752 = vmatmul.mubr.msk.bf16.vlgmr.msra.gmra.mrb[48].mxu0 %vm1673_vm0, %v2244_v20  ;;  %v3955_v20 = vld [vmem:[%s4989_s18 + $0x60] ss:$8 sps:$4 sm:$0xff]  }
 0x59c   : > { %v3733_v22 = vpop.f32.mrb[84].mxu1 }
 0x59d   : > { %v2189_v23 = vadd.f32 %v3733_v22, %v3449_v2  ;;  %v2180_v24 = vpop.f32.mrb[85].mxu1  ;;  %v3958_v22 = vld [vmem:[%s4989_s18 + $0x70] ss:$8 sps:$4 sm:$0xff]  }
 0x59e   : > { %v2181_v25 = vadd.f32 %v3449_v2, %v2180_v24  ;;  %v3734_v26 = vpop.f32.mrb[86].mxu1  ;;  %v3961_v24 = vld [vmem:[%s4989_s18 + $0x80] ss:$8 sps:$4 sm:$0xff]  }
 0x59f   : > { %v2192_v27 = vadd.f32 %v3734_v26, %v3449_v2  ;;  %v2183_v28 = vpop.f32.mrb[87].mxu1  ;;  %v2233_v30 = vmax.f32 %v2189_v23, 0.0  ;;  %v3963_v23 = vld [vmem:[%s4989_s18 + $0x84] ss:$8 sps:$4 sm:$0xff]   ;;  %v3964_v26 = vld [vmem:[%s4989_s18 + $0x90] ss:$8 sps:$4 sm:$0xff]  }
 0x5a0   : > { %v2184_v29 = vadd.f32 %v3449_v2, %v2183_v28  ;;  %v2231_v32 = vmax.f32 %v2181_v25, 0.0  ;;  %v3966_v25 = vld [vmem:[%s4989_s18 + $0x94] ss:$8 sps:$4 sm:$0xff]   ;;  %v3967_v28 = vld [vmem:[%s4989_s18 + $0xa0] ss:$8 sps:$4 sm:$0xff]  }
 0x5a1   : > { %v2234_v31 = vmax.f32 %v2192_v27, 0.0  ;;  %v3969_v27 = vld [vmem:[%s4989_s18 + $0xa4] ss:$8 sps:$4 sm:$0xff]  }
 0x5a2   : > { %v2232_v33 = vmax.f32 %v2184_v29, 0.0  ;;  %v3972_v29 = vld [vmem:[%s4989_s18 + $0xb4] ss:$8 sps:$4 sm:$0xff]  }
 0x5a3   : > { %v2246_v34 = vpack.c.bf16 %v2234_v31, %v2233_v30  ;;  %v3970_v30 = vld [vmem:[%s4989_s18 + $0xb0] ss:$8 sps:$4 sm:$0xff]   ;;  %v3975_v31 = vld [vmem:[%s4989_s18 + $0xc4] ss:$8 sps:$4 sm:$0xff]  }
 0x5a4   : > { %v2245_v35 = vpack.c.bf16 %v2232_v33, %v2231_v32  ;;  %v3973_v32 = vld [vmem:[%s4989_s18 + $0xc0] ss:$8 sps:$4 sm:$0xff]   ;;  %v3978_v33 = vld [vmem:[%s4989_s18 + $0xd4] ss:$8 sps:$4 sm:$0xff]  }
 0x5a6   : > { %3755 = vmatprep.mubr.msk.bf16.mxu0 %vm1673_vm0, %v2245_v35  ;;  %v3458_v35 = vld [vmem:[%s4986_s15] ss:$0 sm:$0xff] }
 0x5a7   : > { %3756 = vmatmul.mubr.msk.bf16.gmra.mrb[52].mxu0 %vm1673_vm0, %v2246_v34  ;;  %v3976_v34 = vld [vmem:[%s4989_s18 + $0xd0] ss:$8 sps:$4 sm:$0xff]  }
 0x5ac   : > { %v3737_v36 = vpop.f32.mrb[88].mxu1 }
 0x5ad   : > { %v2205_v37 = vadd.f32 %v3737_v36, %v3449_v2  ;;  %v2196_v38 = vpop.f32.mrb[89].mxu1 }
 0x5ae   : > { %v2197_v39 = vadd.f32 %v3449_v2, %v2196_v38  ;;  %v3738_v40 = vpop.f32.mrb[90].mxu1 }
 0x5af   : > { %v2208_v42 = vadd.f32 %v3738_v40, %v3449_v2  ;;  %v2199_v43 = vpop.f32.mrb[91].mxu1  ;;  %v2237_v44 = vmax.f32 %v2205_v37, 0.0 }
 0x5b0   : > { %v2200_v14 = vadd.f32 %v3449_v2, %v2199_v43  ;;  %v2235_v46 = vmax.f32 %v2197_v39, 0.0 }
 0x5b1   : > { %v2238_v45 = vmax.f32 %v2208_v42, 0.0 }
 0x5b2   : > { %v2236_v49 = vmax.f32 %v2200_v14, 0.0 }
 0x5b3   : > { %v2248_v50 = vpack.c.bf16 %v2238_v45, %v2237_v44 }
 0x5b4   : > { %v2247_v51 = vpack.c.bf16 %v2236_v49, %v2235_v46 }
 0x5b6   : > { %3759 = vmatprep.mubr.msk.bf16.mxu0 %vm1673_vm0, %v2247_v51 }
 0x5b7   : > { %3760 = vmatmul.mubr.msk.bf16.gmra.mrb[56].mxu0 %vm1673_vm0, %v2248_v50 }
 0x5bc   : > { %v3741_v52 = vpop.f32.mrb[92].mxu1 }
 0x5bd   : > { %v2221_v53 = vadd.f32 %v3741_v52, %v3449_v2  ;;  %v2212_v54 = vpop.f32.mrb[93].mxu1 }
 0x5be   : > { %v2213_v55 = vadd.f32 %v3449_v2, %v2212_v54  ;;  %v3742_v47 = vpop.f32.mrb[94].mxu1 }
 0x5bf   : > { %v2224_v48 = vadd.f32 %v3742_v47, %v3449_v2  ;;  %v2215_v56 = vpop.f32.mrb[95].mxu1  ;;  %v2241_v58 = vmax.f32 %v2221_v53, 0.0 }
 0x5c0   : > { %v2216_v57 = vadd.f32 %v3449_v2, %v2215_v56  ;;  %v2239_v60 = vmax.f32 %v2213_v55, 0.0  ;;  %v3937_v2 = vld [vmem:[%s4989_s18] ss:$8 sps:$4 sm:$0xff]  }
 0x5c1   : > { %v2242_v59 = vmax.f32 %v2224_v48, 0.0  ;;  %2909 = vmatpush1.bf16.msra.mxu0 %v3937_v2 }
 0x5c2   : > { %v2240_v61 = vmax.f32 %v2216_v57, 0.0  ;;  %2910 = vmatprep.subr.bf16.mxu0 %v3942_v8 }
 0x5c3   : > { %v2250_v62 = vpack.c.bf16 %v2242_v59, %v2241_v58 }
 0x5c4   : > { %v2249_v63 = vpack.c.bf16 %v2240_v61, %v2239_v60 }
 0x5c5   : > { %2911 = vmatpush1.bf16.msra.mxu0 %v3940_v9 }
 0x5c6   : > { %3763 = vmatprep.mubr.msk.bf16.mxu0 %vm1673_vm0, %v2249_v63  ;;  %2912 = vmatprep.subr.bf16.mxu0 %v3945_v10 }
 0x5c7   : > { %3764 = vmatmul.mubr.msk.bf16.gmra.mrb[60].mxu0 %vm1673_vm0, %v2250_v62 }
 0x5c9   : > { %2913 = vmatpush1.bf16.msra.mxu0 %v3943_v11 }
 0x5ca   : > { %2914 = vmatprep.subr.bf16.mxu0 %v3948_v12 }
 0x5cd   : > { %2915 = vmatpush1.bf16.msra.mxu0 %v3946_v13 }
 0x5ce   : > { %2916 = vmatprep.subr.bf16.mxu0 %v3951_v15 }
 0x5d1   : > { %2917 = vmatpush1.bf16.msra.mxu0 %v3949_v16 }
 0x5d2   : > { %2918 = vmatprep.subr.bf16.mxu0 %v3954_v17 }
 0x5d5   : > { %2919 = vmatpush1.bf16.msra.mxu0 %v3952_v18 }
 0x5d6   : > { %2920 = vmatprep.subr.bf16.mxu0 %v3957_v19 }
 0x5d9   : > { %2921 = vmatpush1.bf16.msra.mxu0 %v3955_v20 }
 0x5da   : > { %2922 = vmatprep.subr.bf16.mxu0 %v3960_v21 }
 0x5dd   : > { %2923 = vmatpush1.bf16.msra.mxu0 %v3958_v22 }
 0x5de   : > { %2924 = vmatprep.subr.bf16.mxu0 %v3963_v23 }
 0x5e1   : > { %2925 = vmatpush1.bf16.msra.mxu0 %v3961_v24 }
 0x5e2   : > { %2926 = vmatprep.subr.bf16.mxu0 %v3966_v25 }
 0x5e5   : > { %2927 = vmatpush1.bf16.msra.mxu0 %v3964_v26 }
 0x5e6   : > { %2928 = vmatprep.subr.bf16.mxu0 %v3969_v27 }
 0x5e9   : > { %2929 = vmatpush1.bf16.msra.mxu0 %v3967_v28 }
 0x5ea   : > { %2930 = vmatprep.subr.bf16.mxu0 %v3972_v29 }
 0x5ed   : > { %2931 = vmatpush1.bf16.msra.mxu0 %v3970_v30 }
 0x5ee   : > { %2932 = vmatprep.subr.bf16.mxu0 %v3975_v31  ;;  %v3981_v31 = vld [vmem:[%s4989_s18 + $0xe4] ss:$8 sps:$4 sm:$0xff]  }
 0x5f1   : > { %2933 = vmatpush1.bf16.msra.mxu0 %v3973_v32  ;;  %v3979_v32 = vld [vmem:[%s4989_s18 + $0xe0] ss:$8 sps:$4 sm:$0xff]  }
 0x5f2   : > { %2934 = vmatprep.subr.bf16.mxu0 %v3978_v33  ;;  %v3984_v33 = vld [vmem:[%s4989_s18 + $0xf4] ss:$8 sps:$4 sm:$0xff]  }
 0x5f5   : > { %2935 = vmatpush1.bf16.msra.mxu0 %v3976_v34  ;;  %v3982_v34 = vld [vmem:[%s4989_s18 + $0xf0] ss:$8 sps:$4 sm:$0xff]  }
 0x5f6   : > { %2936 = vmatprep.subr.bf16.mxu0 %v3981_v31 }
 0x5f9   : > { %2937 = vmatpush1.bf16.msra.mxu0 %v3979_v32 }
 0x5fa   : > { %2938 = vmatprep.subr.bf16.mxu0 %v3984_v33 }
 0x5fd   : > { %2939 = vmatpush1.bf16.msra.mxu0 %v3982_v34 }
 0x66a   : > { %v3753_v36 = vpop.f32.mrb[48].mxu0 }
 0x66b   : > { %v2357_v37 = vadd.f32 %v3753_v36, %v3458_v35  ;;  %v2348_v38 = vpop.f32.mrb[49].mxu0 }
 0x66c   : > { %v2349_v39 = vadd.f32 %v3458_v35, %v2348_v38  ;;  %v3754_v40 = vpop.f32.mrb[50].mxu0 }
 0x66d   : > { %v2360_v42 = vadd.f32 %v3754_v40, %v3458_v35  ;;  %v2351_v43 = vpop.f32.mrb[51].mxu0  ;;  %v2413_v44 = vmax.f32 %v2357_v37, 0.0 }
 0x66e   : > { %v2352_v14 = vadd.f32 %v3458_v35, %v2351_v43  ;;  %v2411_v46 = vmax.f32 %v2349_v39, 0.0 }
 0x66f   : > { %v2414_v45 = vmax.f32 %v2360_v42, 0.0 }
 0x670   : > { %v2412_v49 = vmax.f32 %v2352_v14, 0.0 }
 0x671   : > { %v2428_v50 = vpack.c.bf16 %v2414_v45, %v2413_v44 }
 0x672   : > { %v2427_v51 = vpack.c.bf16 %v2412_v49, %v2411_v46 }
 0x674   : > { %2576 = vmatmul.mubr.bf16.vlgmr.msra.gmra.mrb[96].mxu1 %v2427_v51 }
 0x675   : > { %2585 = vmatprep.mubr.bf16.mxu1 %v4057_v41 }
 0x67a   : > { %v3757_v52 = vpop.f32.mrb[52].mxu0 }
 0x67b   : > { %v2373_v53 = vadd.f32 %v3757_v52, %v3458_v35  ;;  %v2364_v54 = vpop.f32.mrb[53].mxu0 }
 0x67c   : > { %v2365_v55 = vadd.f32 %v3458_v35, %v2364_v54  ;;  %v3758_v47 = vpop.f32.mrb[54].mxu0  ;;  %2586 = vmatmul.mubr.bf16.gmra.mrb[100].mxu1 %v2428_v50 }
 0x67d   : > { %v2376_v48 = vadd.f32 %v3758_v47, %v3458_v35  ;;  %v2367_v56 = vpop.f32.mrb[55].mxu0  ;;  %2595 = vmatprep.mubr.bf16.mxu1 %v4057_v41  ;;  %v2417_v58 = vmax.f32 %v2373_v53, 0.0 }
 0x67e   : > { %v2368_v57 = vadd.f32 %v3458_v35, %v2367_v56  ;;  %v2415_v60 = vmax.f32 %v2365_v55, 0.0 }
 0x67f   : > { %v2418_v59 = vmax.f32 %v2376_v48, 0.0 }
 0x680   : > { %v2416_v61 = vmax.f32 %v2368_v57, 0.0 }
 0x681   : > { %v2430_v62 = vpack.c.bf16 %v2418_v59, %v2417_v58 }
 0x682   : > { %v2429_v63 = vpack.c.bf16 %v2416_v61, %v2415_v60 }
 0x684   : > { %2596 = vmatmul.mubr.bf16.gmra.mrb[104].mxu1 %v2429_v63 }
 0x685   : > { %2605 = vmatprep.mubr.bf16.mxu1 %v4057_v41 }
 0x68a   : > { %v3761_v0 = vpop.f32.mrb[56].mxu0 }
 0x68b   : > { %v2389_v1 = vadd.f32 %v3761_v0, %v3458_v35  ;;  %v2380_v6 = vpop.f32.mrb[57].mxu0 }
 0x68c   : > { %v2381_v7 = vadd.f32 %v3458_v35, %v2380_v6  ;;  %v3762_v2 = vpop.f32.mrb[58].mxu0  ;;  %2606 = vmatmul.mubr.bf16.gmra.mrb[108].mxu1 %v2430_v62 }
 0x68d   : > { %v2392_v4 = vadd.f32 %v3762_v2, %v3458_v35  ;;  %v2383_v8 = vpop.f32.mrb[59].mxu0  ;;  %2615 = vmatprep.mubr.bf16.mxu1 %v4057_v41  ;;  %v2421_v10 = vmax.f32 %v2389_v1, 0.0 }
 0x68e   : > { %v2384_v9 = vadd.f32 %v3458_v35, %v2383_v8  ;;  %v2419_v12 = vmax.f32 %v2381_v7, 0.0 }
 0x68f   : > { %v2422_v11 = vmax.f32 %v2392_v4, 0.0 }
 0x690   : > { %v2420_v13 = vmax.f32 %v2384_v9, 0.0 }
 0x691   : > { %v2432_v15 = vpack.c.bf16 %v2422_v11, %v2421_v10 }
 0x692   : > { %v2431_v16 = vpack.c.bf16 %v2420_v13, %v2419_v12 }
 0x694   : > { %2616 = vmatmul.mubr.bf16.gmra.mrb[112].mxu1 %v2431_v16 }
 0x695   : > { %2625 = vmatprep.mubr.bf16.mxu1 %v4057_v41 }
 0x69a   : > { %v3765_v17 = vpop.f32.mrb[60].mxu0 }
 0x69b   : > { %v2405_v18 = vadd.f32 %v3765_v17, %v3458_v35  ;;  %v2396_v19 = vpop.f32.mrb[61].mxu0 }
 0x69c   : > { %v2397_v20 = vadd.f32 %v3458_v35, %v2396_v19  ;;  %v3766_v21 = vpop.f32.mrb[62].mxu0  ;;  %2626 = vmatmul.mubr.bf16.gmra.mrb[116].mxu1 %v2432_v15 }
 0x69d   : > { %v2408_v22 = vadd.f32 %v3766_v21, %v3458_v35  ;;  %v2399_v23 = vpop.f32.mrb[63].mxu0  ;;  %2635 = vmatprep.mubr.bf16.mxu1 %v4057_v41  ;;  %v2425_v25 = vmax.f32 %v2405_v18, 0.0 }
 0x69e   : > { %v2400_v24 = vadd.f32 %v3458_v35, %v2399_v23  ;;  %v2423_v27 = vmax.f32 %v2397_v20, 0.0 }
 0x69f   : > { %v2426_v26 = vmax.f32 %v2408_v22, 0.0 }
 0x6a0   : > { %v2424_v28 = vmax.f32 %v2400_v24, 0.0 }
 0x6a1   : > { %v2434_v29 = vpack.c.bf16 %v2426_v26, %v2425_v25 }
 0x6a2   : > { %v2433_v30 = vpack.c.bf16 %v2424_v28, %v2423_v27 }
 0x6a4   : > { %2636 = vmatmul.mubr.bf16.gmra.mrb[120].mxu1 %v2433_v30 }
 0x6a5   : > { %2645 = vmatprep.mubr.bf16.mxu1 %v4057_v41  ;;  %v2451_v41 = vld [vmem:[%s4988_s17] sm:$0x3] }
 0x6a6   : > { %v4852_v35 = vrot.slane %v2451_v41, %v4349_v3  ;;  %v4855_v36 = vrot.slane %v2451_v41, %v4354_v5 }
 0x6ac   : > { %2646 = vmatmul.mubr.bf16.gmra.mrb[124].mxu1 %v2434_v29 }
 0x747   : > { %v2577_v37 = vpop.f32.mrb[96].mxu1 }
 0x748   : > { %v2578_v38 = vadd.f32 %v2577_v37, %v4852_v35  ;;  %v2579_v39 = vpop.f32.mrb[97].mxu1 }
 0x749   : > { %v2580_v40 = vadd.f32 %v2579_v39, %v4855_v36  ;;  %v2581_v42 = vpop.f32.mrb[98].mxu1 }
 0x74a   : > { %v2582_v43 = vadd.f32 %v2581_v42, %v4852_v35  ;;  %v2583_v14 = vpop.f32.mrb[99].mxu1  ;;  %v2656_v45 = vmax.f32 %v2578_v38, 0.0 }
 0x74b   : > { %v2584_v44 = vadd.f32 %v2583_v14, %v4855_v36  ;;  %v2657_v49 = vmax.f32 %v2580_v40, 0.0 }
 0x74c   : > { %v2658_v46 = vmax.f32 %v2582_v43, 0.0 }
 0x74d   : > { %v2659_v50 = vmax.f32 %v2584_v44, 0.0 }
 0x74e   : > { %v2688_v51 = vpack.c.bf16 %v2658_v46, %v2656_v45 }
 0x74f   : > { %v2689_v52 = vpack.c.bf16 %v2659_v50, %v2657_v49  ;;  %v2587_v53 = vpop.f32.mrb[100].mxu1 }
 0x750   : > { %v2588_v54 = vadd.f32 %v2587_v53, %v4852_v35  ;;  %v2589_v55 = vpop.f32.mrb[101].mxu1 }
 0x751   : > { %v2590_v47 = vadd.f32 %v2589_v55, %v4855_v36  ;;  %v2591_v48 = vpop.f32.mrb[102].mxu1  ;;  %2940 = vmatprep.mubr.bf16.mxu0 %v2689_v52 }
 0x752   : > { %v2592_v56 = vadd.f32 %v2591_v48, %v4852_v35  ;;  %v2593_v57 = vpop.f32.mrb[103].mxu1  ;;  %2941 = vmatmul.mubr.bf16.vlgmr.msra.gmra.mrb[64].mxu0 %v2688_v51  ;;  %v2660_v59 = vmax.f32 %v2588_v54, 0.0 }
 0x753   : > { %v2594_v58 = vadd.f32 %v2593_v57, %v4855_v36  ;;  %v2661_v61 = vmax.f32 %v2590_v47, 0.0 }
 0x754   : > { %v2662_v60 = vmax.f32 %v2592_v56, 0.0 }
 0x755   : > { %v2663_v62 = vmax.f32 %v2594_v58, 0.0 }
 0x756   : > { %v2690_v63 = vpack.c.bf16 %v2662_v60, %v2660_v59 }
 0x757   : > { %v2691_v0 = vpack.c.bf16 %v2663_v62, %v2661_v61  ;;  %v2597_v1 = vpop.f32.mrb[104].mxu1 }
 0x758   : > { %v2598_v6 = vadd.f32 %v2597_v1, %v4852_v35  ;;  %v2599_v7 = vpop.f32.mrb[105].mxu1 }
 0x759   : > { %v2600_v2 = vadd.f32 %v2599_v7, %v4855_v36  ;;  %v2601_v4 = vpop.f32.mrb[106].mxu1  ;;  %2950 = vmatprep.mubr.bf16.mxu0 %v2691_v0 }
 0x75a   : > { %v2602_v8 = vadd.f32 %v2601_v4, %v4852_v35  ;;  %v2603_v9 = vpop.f32.mrb[107].mxu1  ;;  %2951 = vmatmul.mubr.bf16.gmra.mrb[68].mxu0 %v2690_v63  ;;  %v2664_v11 = vmax.f32 %v2598_v6, 0.0 }
 0x75b   : > { %v2604_v10 = vadd.f32 %v2603_v9, %v4855_v36  ;;  %v2665_v13 = vmax.f32 %v2600_v2, 0.0 }
 0x75c   : > { %v2666_v12 = vmax.f32 %v2602_v8, 0.0 }
 0x75d   : > { %v2667_v15 = vmax.f32 %v2604_v10, 0.0 }
 0x75e   : > { %v2692_v16 = vpack.c.bf16 %v2666_v12, %v2664_v11 }
 0x75f   : > { %v2693_v17 = vpack.c.bf16 %v2667_v15, %v2665_v13  ;;  %v2607_v18 = vpop.f32.mrb[108].mxu1 }
 0x760   : > { %v2608_v19 = vadd.f32 %v2607_v18, %v4852_v35  ;;  %v2609_v20 = vpop.f32.mrb[109].mxu1 }
 0x761   : > { %v2610_v21 = vadd.f32 %v2609_v20, %v4855_v36  ;;  %v2611_v22 = vpop.f32.mrb[110].mxu1  ;;  %2960 = vmatprep.mubr.bf16.mxu0 %v2693_v17 }
 0x762   : > { %v2612_v23 = vadd.f32 %v2611_v22, %v4852_v35  ;;  %v2613_v24 = vpop.f32.mrb[111].mxu1  ;;  %2961 = vmatmul.mubr.bf16.gmra.mrb[72].mxu0 %v2692_v16  ;;  %v2668_v26 = vmax.f32 %v2608_v19, 0.0 }
 0x763   : > { %v2614_v25 = vadd.f32 %v2613_v24, %v4855_v36  ;;  %v2669_v28 = vmax.f32 %v2610_v21, 0.0 }
 0x764   : > { %v2670_v27 = vmax.f32 %v2612_v23, 0.0 }
 0x765   : > { %v2671_v29 = vmax.f32 %v2614_v25, 0.0 }
 0x766   : > { %v2694_v30 = vpack.c.bf16 %v2670_v27, %v2668_v26 }
 0x767   : > { %v2695_v31 = vpack.c.bf16 %v2671_v29, %v2669_v28  ;;  %v2617_v32 = vpop.f32.mrb[112].mxu1  ;;  %v2736_v28 = vld [vmem:[%s4990_s19] sm:$0x3] }
 0x768   : > { %v2618_v33 = vadd.f32 %v2617_v32, %v4852_v35  ;;  %v2619_v34 = vpop.f32.mrb[113].mxu1  ;;  %v4893_v29 = vrot.slane %v2736_v28, %v4349_v3 }
 0x769   : > { %v2620_v41 = vadd.f32 %v2619_v34, %v4855_v36  ;;  %v2621_v37 = vpop.f32.mrb[114].mxu1  ;;  %2970 = vmatprep.mubr.bf16.mxu0 %v2695_v31 }
 0x76a   : > { %v2622_v38 = vadd.f32 %v2621_v37, %v4852_v35  ;;  %v2623_v39 = vpop.f32.mrb[115].mxu1  ;;  %2971 = vmatmul.mubr.bf16.gmra.mrb[76].mxu0 %v2694_v30  ;;  %v2672_v42 = vmax.f32 %v2618_v33, 0.0 }
 0x76b   : > { %v2624_v40 = vadd.f32 %v2623_v39, %v4855_v36  ;;  %v2673_v14 = vmax.f32 %v2620_v41, 0.0 }
 0x76c   : > { %v2674_v43 = vmax.f32 %v2622_v38, 0.0 }
 0x76d   : > { %v2675_v44 = vmax.f32 %v2624_v40, 0.0 }
 0x76e   : > { %v2696_v45 = vpack.c.bf16 %v2674_v43, %v2672_v42 }
 0x76f   : > { %v2697_v46 = vpack.c.bf16 %v2675_v44, %v2673_v14  ;;  %v2627_v49 = vpop.f32.mrb[116].mxu1 }
 0x770   : > { %v2628_v50 = vadd.f32 %v2627_v49, %v4852_v35  ;;  %v2629_v51 = vpop.f32.mrb[117].mxu1 }
 0x771   : > { %v2630_v52 = vadd.f32 %v2629_v51, %v4855_v36  ;;  %v2631_v53 = vpop.f32.mrb[118].mxu1  ;;  %2980 = vmatprep.mubr.bf16.mxu0 %v2697_v46 }
 0x772   : > { %v2632_v54 = vadd.f32 %v2631_v53, %v4852_v35  ;;  %v2633_v55 = vpop.f32.mrb[119].mxu1  ;;  %2981 = vmatmul.mubr.bf16.gmra.mrb[80].mxu0 %v2696_v45  ;;  %v2676_v48 = vmax.f32 %v2628_v50, 0.0 }
 0x773   : > { %v2634_v47 = vadd.f32 %v2633_v55, %v4855_v36  ;;  %v2677_v57 = vmax.f32 %v2630_v52, 0.0 }
 0x774   : > { %v2678_v56 = vmax.f32 %v2632_v54, 0.0 }
 0x775   : > { %v2679_v58 = vmax.f32 %v2634_v47, 0.0 }
 0x776   : > { %v2698_v59 = vpack.c.bf16 %v2678_v56, %v2676_v48 }
 0x777   : > { %v2699_v60 = vpack.c.bf16 %v2679_v58, %v2677_v57  ;;  %v2637_v61 = vpop.f32.mrb[120].mxu1 }
 0x778   : > { %v2638_v62 = vadd.f32 %v2637_v61, %v4852_v35  ;;  %v2639_v63 = vpop.f32.mrb[121].mxu1 }
 0x779   : > { %v2640_v0 = vadd.f32 %v2639_v63, %v4855_v36  ;;  %v2641_v1 = vpop.f32.mrb[122].mxu1  ;;  %2990 = vmatprep.mubr.bf16.mxu0 %v2699_v60 }
 0x77a   : > { %v2642_v6 = vadd.f32 %v2641_v1, %v4852_v35  ;;  %v2643_v7 = vpop.f32.mrb[123].mxu1  ;;  %2991 = vmatmul.mubr.bf16.gmra.mrb[84].mxu0 %v2698_v59  ;;  %v2680_v4 = vmax.f32 %v2638_v62, 0.0 }
 0x77b   : > { %v2644_v2 = vadd.f32 %v2643_v7, %v4855_v36  ;;  %v2681_v9 = vmax.f32 %v2640_v0, 0.0 }
 0x77c   : > { %v2682_v8 = vmax.f32 %v2642_v6, 0.0 }
 0x77d   : > { %v2683_v10 = vmax.f32 %v2644_v2, 0.0 }
 0x77e   : > { %v2700_v11 = vpack.c.bf16 %v2682_v8, %v2680_v4 }
 0x77f   : > { %v2701_v12 = vpack.c.bf16 %v2683_v10, %v2681_v9  ;;  %v2647_v13 = vpop.f32.mrb[124].mxu1 }
 0x780   : > { %v2648_v15 = vadd.f32 %v2647_v13, %v4852_v35  ;;  %v2649_v16 = vpop.f32.mrb[125].mxu1 }
 0x781   : > { %v2650_v17 = vadd.f32 %v2649_v16, %v4855_v36  ;;  %v2651_v18 = vpop.f32.mrb[126].mxu1  ;;  %3000 = vmatprep.mubr.bf16.mxu0 %v2701_v12 }
 0x782   : > { %v2652_v19 = vadd.f32 %v2651_v18, %v4852_v35  ;;  %v2653_v20 = vpop.f32.mrb[127].mxu1  ;;  %3001 = vmatmul.mubr.bf16.gmra.mrb[88].mxu0 %v2700_v11  ;;  %v2684_v22 = vmax.f32 %v2648_v15, 0.0  ;;  %v4896_v35 = vrot.slane %v2736_v28, %v4354_v5 }
 0x783   : > { %v2654_v21 = vadd.f32 %v2653_v20, %v4855_v36  ;;  %v2685_v24 = vmax.f32 %v2650_v17, 0.0 }
 0x784   : > { %v2686_v23 = vmax.f32 %v2652_v19, 0.0 }
 0x785   : > { %v2687_v25 = vmax.f32 %v2654_v21, 0.0 }
 0x786   : > { %v2702_v26 = vpack.c.bf16 %v2686_v23, %v2684_v22 }
 0x787   : > { %v2703_v27 = vpack.c.bf16 %v2687_v25, %v2685_v24 }
 0x789   : > { %3010 = vmatprep.mubr.bf16.mxu0 %v2703_v27 }
 0x78a   : > { %3011 = vmatmul.mubr.bf16.gmra.mrb[92].mxu0 %v2702_v26 }
 0x825   : > { %v2942_v30 = vpop.f32.mrb[64].mxu0 }
 0x826   : > { %v2943_v36 = vadd.f32 %v2942_v30, %v4893_v29  ;;  %v2944_v31 = vpop.f32.mrb[65].mxu0 }
 0x827   : > { %v2945_v32 = vadd.f32 %v2944_v31, %v4896_v35  ;;  %v2946_v33 = vpop.f32.mrb[66].mxu0 }
 0x828   : > { %v3021_v34 = vmul.f32 0.5, %v2943_v36  ;;  %v2947_v41 = vadd.f32 %v2946_v33, %v4893_v29  ;;  %v2948_v37 = vpop.f32.mrb[67].mxu0 }
 0x829   : > { %v3022_v38 = vmul.f32 0.5, %v2945_v32  ;;  %v2949_v39 = vadd.f32 %v2948_v37, %v4896_v35 }
 0x82a   : > { %3985 = vtanh.f32 %v3021_v34  ;;  %v3023_v3 = vmul.f32 0.5, %v2947_v41 }
 0x82b   : > { %3987 = vtanh.f32 %v3022_v38  ;;  %v3024_v5 = vmul.f32 0.5, %v2949_v39 }
 0x82c   : > { %3989 = vtanh.f32 %v3023_v3 }
 0x82d   : > { %3991 = vtanh.f32 %v3024_v5  ;;  %v2952_v40 = vpop.f32.mrb[68].mxu0 }
 0x82e   : > { %v2953_v42 = vadd.f32 %v2952_v40, %v4893_v29  ;;  %v2954_v43 = vpop.f32.mrb[69].mxu0 }
 0x82f   : > { %v2955_v14 = vadd.f32 %v2954_v43, %v4896_v35  ;;  %v2956_v44 = vpop.f32.mrb[70].mxu0 }
 0x830   : > { %v3025_v45 = vmul.f32 0.5, %v2953_v42  ;;  %v2957_v46 = vadd.f32 %v2956_v44, %v4893_v29  ;;  %v2958_v49 = vpop.f32.mrb[71].mxu0 }
 0x831   : > { %v3026_v50 = vmul.f32 0.5, %v2955_v14  ;;  %v2959_v51 = vadd.f32 %v2958_v49, %v4896_v35 }
 0x832   : > { %3993 = vtanh.f32 %v3025_v45  ;;  %v3027_v52 = vmul.f32 0.5, %v2957_v46 }
 0x833   : > { %3995 = vtanh.f32 %v3026_v50  ;;  %v3028_v53 = vmul.f32 0.5, %v2959_v51 }
 0x834   : > { %v3986_v54 = vpop.eup %3985  ;;  %3997 = vtanh.f32 %v3027_v52 }
 0x835   : > { %v3988_v55 = vpop.eup %3987  ;;  %v3085_v47 = vadd.f32 1.0, %v3986_v54  ;;  %3999 = vtanh.f32 %v3028_v53  ;;  %v2962_v48 = vpop.f32.mrb[72].mxu0 }
 0x836   : > { %v3990_v56 = vpop.eup %3989  ;;  %v3086_v57 = vadd.f32 1.0, %v3988_v55  ;;  %v2963_v58 = vadd.f32 %v2962_v48, %v4893_v29  ;;  %v2964_v59 = vpop.f32.mrb[73].mxu0 }
 0x837   : > { %v3992_v60 = vpop.eup %3991  ;;  %v3117_v61 = vmul.f32 0.5, %v3085_v47  ;;  %v3087_v62 = vadd.f32 1.0, %v3990_v56  ;;  %v2965_v63 = vadd.f32 %v2964_v59, %v4896_v35  ;;  %v2966_v0 = vpop.f32.mrb[74].mxu0 }
 0x838   : > { %v3118_v1 = vmul.f32 0.5, %v3086_v57  ;;  %v3088_v6 = vadd.f32 1.0, %v3992_v60  ;;  %v3029_v7 = vmul.f32 0.5, %v2963_v58  ;;  %v2967_v2 = vadd.f32 %v2966_v0, %v4893_v29  ;;  %v2968_v4 = vpop.f32.mrb[75].mxu0 }
 0x839   : > { %3149 = vst [vmem:[%s4910_s4] sm:$0xff] %v3117_v61  ;;  %v3119_v8 = vmul.f32 0.5, %v3087_v62  ;;  %v3030_v9 = vmul.f32 0.5, %v2965_v63  ;;  %v2969_v10 = vadd.f32 %v2968_v4, %v4896_v35 }
 0x83a   : > { %3150 = vst [vmem:[%s4910_s4 + $0x8] sm:$0xff] %v3118_v1  ;;  %v3120_v11 = vmul.f32 0.5, %v3088_v6  ;;  %4001 = vtanh.f32 %v3029_v7  ;;  %v3031_v12 = vmul.f32 0.5, %v2967_v2 }
 0x83b   : > { %3151 = vst [vmem:[%s4910_s4 + $0x10] sm:$0xff] %v3119_v8  ;;  %4003 = vtanh.f32 %v3030_v9  ;;  %v3032_v13 = vmul.f32 0.5, %v2969_v10 }
 0x83c   : > { %v3994_v15 = vpop.eup %3993  ;;  %3152 = vst [vmem:[%s4910_s4 + $0x18] sm:$0xff] %v3120_v11  ;;  %4005 = vtanh.f32 %v3031_v12 }
 0x83d   : > { %v3996_v16 = vpop.eup %3995  ;;  %v3089_v17 = vadd.f32 1.0, %v3994_v15  ;;  %4007 = vtanh.f32 %v3032_v13  ;;  %v2972_v18 = vpop.f32.mrb[76].mxu0 }
 0x83e   : > { %v3998_v19 = vpop.eup %3997  ;;  %v3090_v20 = vadd.f32 1.0, %v3996_v16  ;;  %v2973_v21 = vadd.f32 %v2972_v18, %v4893_v29  ;;  %v2974_v22 = vpop.f32.mrb[77].mxu0 }
 0x83f   : > { %v4000_v23 = vpop.eup %3999  ;;  %v3121_v24 = vmul.f32 0.5, %v3089_v17  ;;  %v3091_v25 = vadd.f32 1.0, %v3998_v19  ;;  %v2975_v26 = vadd.f32 %v2974_v22, %v4896_v35  ;;  %v2976_v27 = vpop.f32.mrb[78].mxu0 }
 0x840   : > { %v3122_v28 = vmul.f32 0.5, %v3090_v20  ;;  %v3092_v30 = vadd.f32 1.0, %v4000_v23  ;;  %v3033_v36 = vmul.f32 0.5, %v2973_v21  ;;  %v2977_v31 = vadd.f32 %v2976_v27, %v4893_v29  ;;  %v2978_v32 = vpop.f32.mrb[79].mxu0 }
 0x841   : > { %3153 = vst [vmem:[%s4910_s4 + $0x20] sm:$0xff] %v3121_v24  ;;  %v3123_v33 = vmul.f32 0.5, %v3091_v25  ;;  %v3034_v34 = vmul.f32 0.5, %v2975_v26  ;;  %v2979_v41 = vadd.f32 %v2978_v32, %v4896_v35 }
 0x842   : > { %3154 = vst [vmem:[%s4910_s4 + $0x28] sm:$0xff] %v3122_v28  ;;  %v3124_v37 = vmul.f32 0.5, %v3092_v30  ;;  %4009 = vtanh.f32 %v3033_v36  ;;  %v3035_v38 = vmul.f32 0.5, %v2977_v31 }
 0x843   : > { %3155 = vst [vmem:[%s4910_s4 + $0x30] sm:$0xff] %v3123_v33  ;;  %4011 = vtanh.f32 %v3034_v34  ;;  %v3036_v39 = vmul.f32 0.5, %v2979_v41 }
 0x844   : > { %v4002_v3 = vpop.eup %4001  ;;  %3156 = vst [vmem:[%s4910_s4 + $0x38] sm:$0xff] %v3124_v37  ;;  %4013 = vtanh.f32 %v3035_v38 }
 0x845   : > { %v4004_v5 = vpop.eup %4003  ;;  %v3093_v40 = vadd.f32 1.0, %v4002_v3  ;;  %4015 = vtanh.f32 %v3036_v39  ;;  %v2982_v42 = vpop.f32.mrb[80].mxu0 }
 0x846   : > { %v4006_v43 = vpop.eup %4005  ;;  %v3094_v14 = vadd.f32 1.0, %v4004_v5  ;;  %v2983_v44 = vadd.f32 %v2982_v42, %v4893_v29  ;;  %v2984_v45 = vpop.f32.mrb[81].mxu0 }
 0x847   : > { %v4008_v46 = vpop.eup %4007  ;;  %v3125_v49 = vmul.f32 0.5, %v3093_v40  ;;  %v3095_v50 = vadd.f32 1.0, %v4006_v43  ;;  %v2985_v51 = vadd.f32 %v2984_v45, %v4896_v35  ;;  %v2986_v52 = vpop.f32.mrb[82].mxu0 }
 0x848   : > { %v3126_v53 = vmul.f32 0.5, %v3094_v14  ;;  %v3096_v54 = vadd.f32 1.0, %v4008_v46  ;;  %v3037_v55 = vmul.f32 0.5, %v2983_v44  ;;  %v2987_v47 = vadd.f32 %v2986_v52, %v4893_v29  ;;  %v2988_v48 = vpop.f32.mrb[83].mxu0 }
 0x849   : > { %3157 = vst [vmem:[%s4910_s4 + $0x40] sm:$0xff] %v3125_v49  ;;  %v3127_v56 = vmul.f32 0.5, %v3095_v50  ;;  %v3038_v57 = vmul.f32 0.5, %v2985_v51  ;;  %v2989_v58 = vadd.f32 %v2988_v48, %v4896_v35 }
 0x84a   : > { %3158 = vst [vmem:[%s4910_s4 + $0x48] sm:$0xff] %v3126_v53  ;;  %v3128_v59 = vmul.f32 0.5, %v3096_v54  ;;  %4017 = vtanh.f32 %v3037_v55  ;;  %v3039_v60 = vmul.f32 0.5, %v2987_v47 }
 0x84b   : > { %3159 = vst [vmem:[%s4910_s4 + $0x50] sm:$0xff] %v3127_v56  ;;  %4019 = vtanh.f32 %v3038_v57  ;;  %v3040_v61 = vmul.f32 0.5, %v2989_v58 }
 0x84c   : > { %v4010_v62 = vpop.eup %4009  ;;  %3160 = vst [vmem:[%s4910_s4 + $0x58] sm:$0xff] %v3128_v59  ;;  %4021 = vtanh.f32 %v3039_v60 }
 0x84d   : > { %v4012_v63 = vpop.eup %4011  ;;  %v3097_v0 = vadd.f32 1.0, %v4010_v62  ;;  %4023 = vtanh.f32 %v3040_v61  ;;  %v2992_v1 = vpop.f32.mrb[84].mxu0 }
 0x84e   : > { %v4014_v6 = vpop.eup %4013  ;;  %v3098_v7 = vadd.f32 1.0, %v4012_v63  ;;  %v2993_v2 = vadd.f32 %v2992_v1, %v4893_v29  ;;  %v2994_v4 = vpop.f32.mrb[85].mxu0 }
 0x84f   : > { %v4016_v8 = vpop.eup %4015  ;;  %v3129_v9 = vmul.f32 0.5, %v3097_v0  ;;  %v3099_v10 = vadd.f32 1.0, %v4014_v6  ;;  %v2995_v11 = vadd.f32 %v2994_v4, %v4896_v35  ;;  %v2996_v12 = vpop.f32.mrb[86].mxu0 }
 0x850   : > { %v3130_v13 = vmul.f32 0.5, %v3098_v7  ;;  %v3100_v15 = vadd.f32 1.0, %v4016_v8  ;;  %v3041_v16 = vmul.f32 0.5, %v2993_v2  ;;  %v2997_v17 = vadd.f32 %v2996_v12, %v4893_v29  ;;  %v2998_v18 = vpop.f32.mrb[87].mxu0 }
 0x851   : > { %3161 = vst [vmem:[%s4910_s4 + $0x60] sm:$0xff] %v3129_v9  ;;  %v3131_v19 = vmul.f32 0.5, %v3099_v10  ;;  %v3042_v20 = vmul.f32 0.5, %v2995_v11  ;;  %v2999_v21 = vadd.f32 %v2998_v18, %v4896_v35 }
 0x852   : > { %3162 = vst [vmem:[%s4910_s4 + $0x68] sm:$0xff] %v3130_v13  ;;  %v3132_v22 = vmul.f32 0.5, %v3100_v15  ;;  %4025 = vtanh.f32 %v3041_v16  ;;  %v3043_v23 = vmul.f32 0.5, %v2997_v17 }
 0x853   : > { %3163 = vst [vmem:[%s4910_s4 + $0x70] sm:$0xff] %v3131_v19  ;;  %4027 = vtanh.f32 %v3042_v20  ;;  %v3044_v24 = vmul.f32 0.5, %v2999_v21 }
 0x854   : > { %v4018_v25 = vpop.eup %4017  ;;  %3164 = vst [vmem:[%s4910_s4 + $0x78] sm:$0xff] %v3132_v22  ;;  %4029 = vtanh.f32 %v3043_v23 }
 0x855   : > { %v4020_v26 = vpop.eup %4019  ;;  %v3101_v27 = vadd.f32 1.0, %v4018_v25  ;;  %4031 = vtanh.f32 %v3044_v24  ;;  %v3002_v28 = vpop.f32.mrb[88].mxu0 }
 0x856   : > { %v4022_v30 = vpop.eup %4021  ;;  %v3102_v36 = vadd.f32 1.0, %v4020_v26  ;;  %v3003_v31 = vadd.f32 %v3002_v28, %v4893_v29  ;;  %v3004_v32 = vpop.f32.mrb[89].mxu0 }
 0x857   : > { %v4024_v33 = vpop.eup %4023  ;;  %v3133_v34 = vmul.f32 0.5, %v3101_v27  ;;  %v3103_v41 = vadd.f32 1.0, %v4022_v30  ;;  %v3005_v37 = vadd.f32 %v3004_v32, %v4896_v35  ;;  %v3006_v38 = vpop.f32.mrb[90].mxu0 }
 0x858   : > { %v3134_v39 = vmul.f32 0.5, %v3102_v36  ;;  %v3104_v3 = vadd.f32 1.0, %v4024_v33  ;;  %v3045_v5 = vmul.f32 0.5, %v3003_v31  ;;  %v3007_v40 = vadd.f32 %v3006_v38, %v4893_v29  ;;  %v3008_v42 = vpop.f32.mrb[91].mxu0 }
 0x859   : > { %3165 = vst [vmem:[%s4910_s4 + $0x80] sm:$0xff] %v3133_v34  ;;  %v3135_v43 = vmul.f32 0.5, %v3103_v41  ;;  %v3046_v14 = vmul.f32 0.5, %v3005_v37  ;;  %v3009_v44 = vadd.f32 %v3008_v42, %v4896_v35 }
 0x85a   : > { %3166 = vst [vmem:[%s4910_s4 + $0x88] sm:$0xff] %v3134_v39  ;;  %v3136_v45 = vmul.f32 0.5, %v3104_v3  ;;  %4033 = vtanh.f32 %v3045_v5  ;;  %v3047_v46 = vmul.f32 0.5, %v3007_v40 }
 0x85b   : > { %3167 = vst [vmem:[%s4910_s4 + $0x90] sm:$0xff] %v3135_v43  ;;  %4035 = vtanh.f32 %v3046_v14  ;;  %v3048_v49 = vmul.f32 0.5, %v3009_v44 }
 0x85c   : > { %v4026_v50 = vpop.eup %4025  ;;  %3168 = vst [vmem:[%s4910_s4 + $0x98] sm:$0xff] %v3136_v45  ;;  %4037 = vtanh.f32 %v3047_v46 }
 0x85d   : > { %v4028_v51 = vpop.eup %4027  ;;  %v3105_v52 = vadd.f32 1.0, %v4026_v50  ;;  %4039 = vtanh.f32 %v3048_v49  ;;  %v3012_v53 = vpop.f32.mrb[92].mxu0 }
 0x85e   : > { %v4030_v54 = vpop.eup %4029  ;;  %v3106_v55 = vadd.f32 1.0, %v4028_v51  ;;  %v3013_v47 = vadd.f32 %v3012_v53, %v4893_v29  ;;  %v3014_v48 = vpop.f32.mrb[93].mxu0 }
 0x85f   : > { %v4032_v56 = vpop.eup %4031  ;;  %v3137_v57 = vmul.f32 0.5, %v3105_v52  ;;  %v3107_v58 = vadd.f32 1.0, %v4030_v54  ;;  %v3015_v59 = vadd.f32 %v3014_v48, %v4896_v35  ;;  %v3016_v60 = vpop.f32.mrb[94].mxu0 }
 0x860   : > { %v3138_v61 = vmul.f32 0.5, %v3106_v55  ;;  %v3108_v62 = vadd.f32 1.0, %v4032_v56  ;;  %v3049_v63 = vmul.f32 0.5, %v3013_v47  ;;  %v3017_v0 = vadd.f32 %v3016_v60, %v4893_v29  ;;  %v3018_v1 = vpop.f32.mrb[95].mxu0 }
 0x861   : > { %3169 = vst [vmem:[%s4910_s4 + $0xa0] sm:$0xff] %v3137_v57  ;;  %v3139_v6 = vmul.f32 0.5, %v3107_v58  ;;  %v3050_v7 = vmul.f32 0.5, %v3015_v59  ;;  %v3019_v2 = vadd.f32 %v3018_v1, %v4896_v35 }
 0x862   : > { %3170 = vst [vmem:[%s4910_s4 + $0xa8] sm:$0xff] %v3138_v61  ;;  %v3140_v4 = vmul.f32 0.5, %v3108_v62  ;;  %4041 = vtanh.f32 %v3049_v63  ;;  %v3051_v8 = vmul.f32 0.5, %v3017_v0 }
 0x863   : > { %3171 = vst [vmem:[%s4910_s4 + $0xb0] sm:$0xff] %v3139_v6  ;;  %4043 = vtanh.f32 %v3050_v7  ;;  %v3052_v9 = vmul.f32 0.5, %v3019_v2 }
 0x864   : > { %v4034_v10 = vpop.eup %4033  ;;  %3172 = vst [vmem:[%s4910_s4 + $0xb8] sm:$0xff] %v3140_v4  ;;  %4045 = vtanh.f32 %v3051_v8 }
 0x865   : > { %v4036_v29 = vpop.eup %4035  ;;  %v3109_v11 = vadd.f32 1.0, %v4034_v10  ;;  %4047 = vtanh.f32 %v3052_v9 }
 0x866   : > { %v4038_v12 = vpop.eup %4037  ;;  %v3110_v13 = vadd.f32 1.0, %v4036_v29 }
 0x867   : > { %v4040_v35 = vpop.eup %4039  ;;  %v3141_v15 = vmul.f32 0.5, %v3109_v11  ;;  %v3111_v16 = vadd.f32 1.0, %v4038_v12 }
 0x868   : > { %v3142_v17 = vmul.f32 0.5, %v3110_v13  ;;  %v3112_v18 = vadd.f32 1.0, %v4040_v35 }
 0x869   : > { %3173 = vst [vmem:[%s4910_s4 + $0xc0] sm:$0xff] %v3141_v15  ;;  %v3143_v19 = vmul.f32 0.5, %v3111_v16 }
 0x86a   : > { %3174 = vst [vmem:[%s4910_s4 + $0xc8] sm:$0xff] %v3142_v17  ;;  %v3144_v20 = vmul.f32 0.5, %v3112_v18 }
 0x86b   : > { %3175 = vst [vmem:[%s4910_s4 + $0xd0] sm:$0xff] %v3143_v19 }
 0x86c   : > { %v4042_v21 = vpop.eup %4041  ;;  %3176 = vst [vmem:[%s4910_s4 + $0xd8] sm:$0xff] %v3144_v20 }
 0x86d   : > { %v4044_v22 = vpop.eup %4043  ;;  %v3113_v23 = vadd.f32 1.0, %v4042_v21 }
 0x86e   : > { %v4046_v24 = vpop.eup %4045  ;;  %v3114_v25 = vadd.f32 1.0, %v4044_v22 }
 0x86f   : > { %v4048_v26 = vpop.eup %4047  ;;  %v3145_v27 = vmul.f32 0.5, %v3113_v23  ;;  %v3115_v28 = vadd.f32 1.0, %v4046_v24 }
 0x870   : > { %v3146_v30 = vmul.f32 0.5, %v3114_v25  ;;  %v3116_v36 = vadd.f32 1.0, %v4048_v26 }
 0x871   : > { %3177 = vst [vmem:[%s4910_s4 + $0xe0] sm:$0xff] %v3145_v27  ;;  %v3147_v31 = vmul.f32 0.5, %v3115_v28 }
 0x872   : > { %3178 = vst [vmem:[%s4910_s4 + $0xe8] sm:$0xff] %v3146_v30  ;;  %v3148_v32 = vmul.f32 0.5, %v3116_v36 }
 0x873   : > { %3179 = vst [vmem:[%s4910_s4 + $0xf0] sm:$0xff] %v3147_v31 }
 0x874   : > { %3180 = vst [vmem:[%s4910_s4 + $0xf8] sm:$0xff] %v3148_v32 }
 0x875 PF: > { %s5011_s1 = sld [smem:[#allocation2_spill]] }
 0x87b   : > { %s32_s2 = sadd.s32 1, %s5011_s1  }
 0x87c   : > { %p29_p4 = scmp.ge.s32.totalorder %s32_s2, 4  }
 0x87e   :  { %31 = sbr.rel (!%p29_p4) target bundleno = 7 (0x7), region = 145 }

</bundles_post_ra>
